<compile_context>
chip_gen: v5e
topology: v5e:2x2
jax: 0.10.0
libtpu: 0.0.40
codegen_flags: <defaults>
</compile_context>

<pallas_src>
import jax
import jax.numpy as jnp
from jax import lax
from jax.experimental import pallas as pl
from jax.experimental.pallas import tpu as pltpu

N_BATCH = 2
C_IN, H_IN, W_IN = 3, 32, 32
C_OUT, KH, KW = 6, 5, 5
H_CONV, W_CONV = H_IN - KH + 1, W_IN - KW + 1      # 28, 28
H_POOL, W_POOL = H_CONV // 2, W_CONV // 2          # 14, 14
FLAT = C_OUT * H_POOL * W_POOL                     # 1176 (hard-coded in the PyTorch view)
HIDDEN = 128                                       # hidden_layer (kept small / lane-friendly)
N_CLASSES = 10

LANES = 128
PATCH_F = C_IN * KH * KW                           # 75 taps per conv output position
ROW_K = W_POOL * PATCH_F                           # 1050: one pooled row (14 positions) of taps
K_PAD = ((ROW_K + LANES - 1) // LANES) * LANES     # 1152
ROW_LANES = W_POOL * C_OUT                         # 84 real output lanes, order (pw, c)
RPG = ((H_POOL * N_BATCH + 7) // 8) * 8            # rows per pooling group: 28 -> 32 (8-aligned)
M_ROWS = 4 * RPG                                   # 128 conv matmul rows
OUT_PAD = LANES                                    # classifier lanes padded 10 -> 128


def _full_spec(shape):
    # whole-array block; everything here is small and fits VMEM comfortably
    return pl.BlockSpec(shape, lambda *_: (0,) * len(shape))


# ---------------- the single fused kernel ----------------
def fused_cnn_kernel(p_ref, cw_ref, cb_ref, w1_ref, b1_ref, w2_ref, b2_ref,
                     o_ref, pool_ref):
    # conv1 as one lane-dense bf16 MXU matmul with f32 accumulation:
    # (128, 1152) @ (1152, 128) -> (128, 128)
    conv = jnp.dot(p_ref[...], cw_ref[...], preferred_element_type=jnp.float32)
    conv = jnp.maximum(conv + cb_ref[...], 0.0)                      # bias + ReLU (f32)

    # MaxPool2d(2,2): rows are grouped by pooling offset (dh,dw) -> elementwise
    # max over four 8-aligned row blocks.  Result rows = (ph, n), lanes = (pw, c).
    pooled = jnp.maximum(
        jnp.maximum(conv[0 * RPG:1 * RPG, :], conv[1 * RPG:2 * RPG, :]),
        jnp.maximum(conv[2 * RPG:3 * RPG, :], conv[3 * RPG:4 * RPG, :]))
    pool_ref[...] = pooled.astype(pool_ref.dtype)                    # bf16 VMEM scratch

    # fc1: channel-major flatten is folded into the (pre-permuted) fc1 weights;
    # accumulate over the 14 pooled rows (same MXU weight traffic as one big matmul).
    # Each 2-row bf16 slice starts at an even sublane index -> one packed sublane.
    h = jnp.zeros((N_BATCH, HIDDEN), jnp.float32)
    for ph in range(H_POOL):
        lhs = pool_ref[pl.ds(ph * N_BATCH, N_BATCH), :]              # (N, 128) bf16
        h = h + jnp.dot(lhs, w1_ref[ph], preferred_element_type=jnp.float32)
    h = jnp.maximum(h + b1_ref[...], 0.0)

    # classifier (f32, tiny), padded to 128 lanes; real logits are the first 10 columns
    o_ref[...] = jnp.dot(h, w2_ref[...], preferred_element_type=jnp.float32) + b2_ref[...]


# ---------------- wrapper-side plumbing (pure data movement, no FLOPs) ----------------
def _build_patches(x):
    """(N,3,32,32) -> (M_ROWS, K_PAD) bf16; rows ordered (pool offset g, ph, n), lanes (pw, tap)."""
    n = x.shape[0]
    taps = []
    for ki in range(KH):
        for kj in range(KW):
            taps.append(x[:, :, ki:ki + H_CONV, kj:kj + W_CONV])     # (N, 3, 28, 28)
    p = jnp.stack(taps, axis=2)                                      # (N, 3, 25, 28, 28)
    p = p.reshape(n, PATCH_F, H_CONV, W_CONV)                        # tap order ci*25+kh*5+kw
    p = p.transpose(0, 2, 3, 1)                                      # (N, 28, 28, 75)
    p = p.reshape(n, H_POOL, 2, W_POOL, 2, PATCH_F)                  # [n, ph, dh, pw, dw, f]
    p = p.transpose(2, 4, 1, 0, 3, 5)                                # [dh, dw, ph, n, pw, f]
    p = p.reshape(4, H_POOL * n, ROW_K)                              # (4, 28, 1050)
    p = jnp.pad(p, ((0, 0), (0, RPG - H_POOL * n), (0, K_PAD - ROW_K)))
    return p.reshape(M_ROWS, K_PAD).astype(jnp.bfloat16)


def _pack_params(params):
    conv_w, conv_b, fc1_w, fc1_b, out_w, out_b = params

    # block-diagonal conv weight: cw[pw'*75 + f, pw*6 + c] = w_t[f, c] iff pw' == pw
    w_t = conv_w.reshape(C_OUT, PATCH_F).T                           # (75, 6), OIHW tap order
    eye = jnp.eye(W_POOL, dtype=w_t.dtype)
    cw = jnp.einsum('pq,fc->pfqc', eye, w_t).reshape(ROW_K, ROW_LANES)
    cw = jnp.pad(cw, ((0, K_PAD - ROW_K), (0, LANES - ROW_LANES)))   # (1152, 128)
    cw = cw.astype(jnp.bfloat16)
    cb = jnp.pad(jnp.tile(conv_b, W_POOL), (0, LANES - ROW_LANES)).reshape(1, LANES)

    # fc1 weights permuted so the kernel's (ph, pw, c) layout matches PyTorch's
    # channel-major x.view(-1, 6*14*14):  w1[ph, pw*6+c, k] = fc1_w[k, c*196 + ph*14 + pw]
    w1 = fc1_w.reshape(HIDDEN, C_OUT, H_POOL, W_POOL).transpose(2, 3, 1, 0)
    w1 = w1.reshape(H_POOL, ROW_LANES, HIDDEN)
    w1 = jnp.pad(w1, ((0, 0), (0, LANES - ROW_LANES), (0, 0)))       # (14, 128, 128)
    w1 = w1.astype(jnp.bfloat16)
    b1 = fc1_b.reshape(1, HIDDEN)

    w2 = jnp.pad(out_w.T, ((0, 0), (0, OUT_PAD - N_CLASSES)))        # (128, 128) f32
    b2 = jnp.pad(out_b, (0, OUT_PAD - N_CLASSES)).reshape(1, OUT_PAD)
    return cw, cb, w1, b1, w2, b2


def cnn_forward(x, params):
    patches = _build_patches(x)
    cw, cb, w1, b1, w2, b2 = _pack_params(params)
    out = pl.pallas_call(
        fused_cnn_kernel,
        out_shape=jax.ShapeDtypeStruct((N_BATCH, OUT_PAD), jnp.float32),
        grid=(1,),
        in_specs=[_full_spec((M_ROWS, K_PAD)),
                  _full_spec((K_PAD, LANES)),
                  _full_spec((1, LANES)),
                  _full_spec((H_POOL, LANES, HIDDEN)),
                  _full_spec((1, HIDDEN)),
                  _full_spec((HIDDEN, OUT_PAD)),
                  _full_spec((1, OUT_PAD))],
        out_specs=_full_spec((N_BATCH, OUT_PAD)),
        scratch_shapes=[pltpu.VMEM((RPG, LANES), jnp.bfloat16)],
        compiler_params=pltpu.CompilerParams(dimension_semantics=("arbitrary",)),
    )(patches, cw, cb, w1, b1, w2, b2)
    return out[:, :N_CLASSES]


# ---------------- deterministic parameter init (PyTorch shapes) ----------------
def init_params(key):
    ks = jax.random.split(key, 6)
    conv_w = jax.random.normal(ks[0], (C_OUT, C_IN, KH, KW), jnp.float32) / jnp.sqrt(C_IN * KH * KW)
    conv_b = jax.random.normal(ks[1], (C_OUT,), jnp.float32) * 0.01
    fc1_w = jax.random.normal(ks[2], (HIDDEN, FLAT), jnp.float32) / jnp.sqrt(FLAT)
    fc1_b = jax.random.normal(ks[3], (HIDDEN,), jnp.float32) * 0.01
    out_w = jax.random.normal(ks[4], (N_CLASSES, HIDDEN), jnp.float32) / jnp.sqrt(HIDDEN)
    out_b = jax.random.normal(ks[5], (N_CLASSES,), jnp.float32) * 0.01
    return conv_w, conv_b, fc1_w, fc1_b, out_w, out_b


# ---------------- pure-JAX reference (semantics check) ----------------
def cnn_reference(x, params):
    conv_w, conv_b, fc1_w, fc1_b, out_w, out_b = params
    n = x.shape[0]
    y = lax.conv_general_dilated(x, conv_w, (1, 1), "VALID",
                                 dimension_numbers=("NCHW", "OIHW", "NCHW"))
    y = jnp.maximum(y + conv_b[None, :, None, None], 0.0)
    y = y.reshape(n, C_OUT, H_POOL, 2, W_POOL, 2).max(axis=(3, 5))
    flat = y.reshape(n, FLAT)
    h = jnp.maximum(flat @ fc1_w.T + fc1_b, 0.0)
    return h @ out_w.T + out_b


if __name__ == "__main__":
    key = jax.random.PRNGKey(0)
    kx, kp = jax.random.split(key)
    x = jax.random.normal(kx, (N_BATCH, C_IN, H_IN, W_IN), jnp.float32)
    params = init_params(kp)

    out = jax.jit(cnn_forward)(x, params)
    out = jax.block_until_ready(out)

    ref = cnn_reference(x, params)
    assert out.shape == (N_BATCH, N_CLASSES), out.shape
    assert bool(jnp.allclose(out, ref, rtol=5e-2, atol=5e-2)), float(jnp.max(jnp.abs(out - ref)))
    print("KERNEL_OK")
</pallas_src>

<mosaic_0001>
module attributes {stable_mosaic.version = 11 : i64} {
  func.func @fused_cnn_kernel(%arg0: i32, %arg1: memref<128x1152xbf16, #tpu.memory_space<vmem>>, %arg2: memref<1152x128xbf16, #tpu.memory_space<vmem>>, %arg3: memref<1x128xf32, #tpu.memory_space<vmem>>, %arg4: memref<14x128x128xbf16, #tpu.memory_space<vmem>>, %arg5: memref<1x128xf32, #tpu.memory_space<vmem>>, %arg6: memref<128x128xf32, #tpu.memory_space<vmem>>, %arg7: memref<1x128xf32, #tpu.memory_space<vmem>>, %arg8: memref<2x128xf32, #tpu.memory_space<vmem>>, %arg9: memref<32x128xbf16, #tpu.memory_space<vmem>>) attributes {dimension_semantics = [#tpu.dimension_semantics<arbitrary>], iteration_bounds = array<i64: 1>, scalar_prefetch = 0 : i64, scratch_operands = 1 : i64, tpu.core_type = #tpu.core_type<tc>, window_params = [{pipeline_mode = #tpu.pipeline_mode<synchronous>, transform_indices = @transform_0, window_bounds = array<i64: 128, 1152>}, {pipeline_mode = #tpu.pipeline_mode<synchronous>, transform_indices = @transform_1, window_bounds = array<i64: 1152, 128>}, {pipeline_mode = #tpu.pipeline_mode<synchronous>, transform_indices = @transform_2, window_bounds = array<i64: 1, 128>}, {pipeline_mode = #tpu.pipeline_mode<synchronous>, transform_indices = @transform_3, window_bounds = array<i64: 14, 128, 128>}, {pipeline_mode = #tpu.pipeline_mode<synchronous>, transform_indices = @transform_4, window_bounds = array<i64: 1, 128>}, {pipeline_mode = #tpu.pipeline_mode<synchronous>, transform_indices = @transform_5, window_bounds = array<i64: 128, 128>}, {pipeline_mode = #tpu.pipeline_mode<synchronous>, transform_indices = @transform_6, window_bounds = array<i64: 1, 128>}, {pipeline_mode = #tpu.pipeline_mode<synchronous>, transform_indices = @transform_7, window_bounds = array<i64: 2, 128>}]} {
    %c0 = arith.constant 0 : index
    %c0_0 = arith.constant 0 : index
    %0 = vector.load %arg1[%c0, %c0_0] : memref<128x1152xbf16, #tpu.memory_space<vmem>>, vector<128x1152xbf16>
    %c0_1 = arith.constant 0 : index
    %c0_2 = arith.constant 0 : index
    %1 = vector.load %arg2[%c0_1, %c0_2] : memref<1152x128xbf16, #tpu.memory_space<vmem>>, vector<1152x128xbf16>
    %cst = arith.constant dense<0.000000e+00> : vector<128x128xf32>
    %2 = tpu.matmul %0, %1, %cst {dimension_numbers = #tpu.dot_dimension_numbers<[1], [0], [0], [1], [0, 0, 1, 1], [], []>} : vector<128x1152xbf16>, vector<1152x128xbf16>, vector<128x128xf32> -> vector<128x128xf32>
    %c0_3 = arith.constant 0 : index
    %c0_4 = arith.constant 0 : index
    %3 = vector.load %arg3[%c0_3, %c0_4] : memref<1x128xf32, #tpu.memory_space<vmem>>, vector<1x128xf32>
    %4 = vector.broadcast %3 : vector<1x128xf32> to vector<128x128xf32>
    %5 = arith.addf %2, %4 : vector<128x128xf32>
    %cst_5 = arith.constant 0.000000e+00 : f32
    %6 = vector.broadcast %cst_5 : f32 to vector<128x128xf32>
    %7 = arith.maximumf %5, %6 : vector<128x128xf32>
    %8 = vector.extract_strided_slice %7 {offsets = [0, 0], sizes = [32, 128], strides = [1, 1]} : vector<128x128xf32> to vector<32x128xf32>
    %9 = vector.extract_strided_slice %7 {offsets = [32, 0], sizes = [32, 128], strides = [1, 1]} : vector<128x128xf32> to vector<32x128xf32>
    %10 = arith.maximumf %8, %9 : vector<32x128xf32>
    %11 = vector.extract_strided_slice %7 {offsets = [64, 0], sizes = [32, 128], strides = [1, 1]} : vector<128x128xf32> to vector<32x128xf32>
    %12 = vector.extract_strided_slice %7 {offsets = [96, 0], sizes = [32, 128], strides = [1, 1]} : vector<128x128xf32> to vector<32x128xf32>
    %13 = arith.maximumf %11, %12 : vector<32x128xf32>
    %14 = arith.maximumf %10, %13 : vector<32x128xf32>
    %15 = arith.truncf %14 : vector<32x128xf32> to vector<32x128xbf16>
    %c0_6 = arith.constant 0 : index
    %c0_7 = arith.constant 0 : index
    %16 = vector.load %arg9[%c0_6, %c0_7] : memref<32x128xbf16, #tpu.memory_space<vmem>>, vector<32x128xbf16>
    tpu.vector_store %arg9[%c0_6, %c0_7], %15 {strides = array<i32>} : memref<32x128xbf16, #tpu.memory_space<vmem>>, vector<32x128xbf16>,
    %cst_8 = arith.constant 0.000000e+00 : f32
    %17 = vector.broadcast %cst_8 : f32 to vector<2x128xf32>
    %c0_9 = arith.constant 0 : index
    %c0_10 = arith.constant 0 : index
    %18 = vector.load %arg9[%c0_9, %c0_10] : memref<32x128xbf16, #tpu.memory_space<vmem>>, vector<2x128xbf16>
    %c0_11 = arith.constant 0 : index
    %c0_12 = arith.constant 0 : index
    %c0_13 = arith.constant 0 : index
    %19 = vector.load %arg4[%c0_11, %c0_12, %c0_13] : memref<14x128x128xbf16, #tpu.memory_space<vmem>>, vector<1x128x128xbf16>
    %20 = vector.shape_cast %19 : vector<1x128x128xbf16> to vector<128x128xbf16>
    %cst_14 = arith.constant dense<0.000000e+00> : vector<2x128xf32>
    %21 = tpu.matmul %18, %20, %cst_14 {dimension_numbers = #tpu.dot_dimension_numbers<[1], [0], [0], [1], [0, 0, 1, 1], [], []>} : vector<2x128xbf16>, vector<128x128xbf16>, vector<2x128xf32> -> vector<2x128xf32>
    %22 = arith.addf %17, %21 : vector<2x128xf32>
    %c2 = arith.constant 2 : index
    %c0_15 = arith.constant 0 : index
    %23 = vector.load %arg9[%c2, %c0_15] : memref<32x128xbf16, #tpu.memory_space<vmem>>, vector<2x128xbf16>
    %c1 = arith.constant 1 : index
    %c0_16 = arith.constant 0 : index
    %c0_17 = arith.constant 0 : index
    %24 = vector.load %arg4[%c1, %c0_16, %c0_17] : memref<14x128x128xbf16, #tpu.memory_space<vmem>>, vector<1x128x128xbf16>
    %25 = vector.shape_cast %24 : vector<1x128x128xbf16> to vector<128x128xbf16>
    %cst_18 = arith.constant dense<0.000000e+00> : vector<2x128xf32>
    %26 = tpu.matmul %23, %25, %cst_18 {dimension_numbers = #tpu.dot_dimension_numbers<[1], [0], [0], [1], [0, 0, 1, 1], [], []>} : vector<2x128xbf16>, vector<128x128xbf16>, vector<2x128xf32> -> vector<2x128xf32>
    %27 = arith.addf %22, %26 : vector<2x128xf32>
    %c4 = arith.constant 4 : index
    %c0_19 = arith.constant 0 : index
    %28 = vector.load %arg9[%c4, %c0_19] : memref<32x128xbf16, #tpu.memory_space<vmem>>, vector<2x128xbf16>
    %c2_20 = arith.constant 2 : index
    %c0_21 = arith.constant 0 : index
    %c0_22 = arith.constant 0 : index
    %29 = vector.load %arg4[%c2_20, %c0_21, %c0_22] : memref<14x128x128xbf16, #tpu.memory_space<vmem>>, vector<1x128x128xbf16>
    %30 = vector.shape_cast %29 : vector<1x128x128xbf16> to vector<128x128xbf16>
    %cst_23 = arith.constant dense<0.000000e+00> : vector<2x128xf32>
    %31 = tpu.matmul %28, %30, %cst_23 {dimension_numbers = #tpu.dot_dimension_numbers<[1], [0], [0], [1], [0, 0, 1, 1], [], []>} : vector<2x128xbf16>, vector<128x128xbf16>, vector<2x128xf32> -> vector<2x128xf32>
    %32 = arith.addf %27, %31 : vector<2x128xf32>
    %c6 = arith.constant 6 : index
    %c0_24 = arith.constant 0 : index
    %33 = vector.load %arg9[%c6, %c0_24] : memref<32x128xbf16, #tpu.memory_space<vmem>>, vector<2x128xbf16>
    %c3 = arith.constant 3 : index
    %c0_25 = arith.constant 0 : index
    %c0_26 = arith.constant 0 : index
    %34 = vector.load %arg4[%c3, %c0_25, %c0_26] : memref<14x128x128xbf16, #tpu.memory_space<vmem>>, vector<1x128x128xbf16>
    %35 = vector.shape_cast %34 : vector<1x128x128xbf16> to vector<128x128xbf16>
    %cst_27 = arith.constant dense<0.000000e+00> : vector<2x128xf32>
    %36 = tpu.matmul %33, %35, %cst_27 {dimension_numbers = #tpu.dot_dimension_numbers<[1], [0], [0], [1], [0, 0, 1, 1], [], []>} : vector<2x128xbf16>, vector<128x128xbf16>, vector<2x128xf32> -> vector<2x128xf32>
    %37 = arith.addf %32, %36 : vector<2x128xf32>
    %c8 = arith.constant 8 : index
    %c0_28 = arith.constant 0 : index
    %38 = vector.load %arg9[%c8, %c0_28] : memref<32x128xbf16, #tpu.memory_space<vmem>>, vector<2x128xbf16>
    %c4_29 = arith.constant 4 : index
    %c0_30 = arith.constant 0 : index
    %c0_31 = arith.constant 0 : index
    %39 = vector.load %arg4[%c4_29, %c0_30, %c0_31] : memref<14x128x128xbf16, #tpu.memory_space<vmem>>, vector<1x128x128xbf16>
    %40 = vector.shape_cast %39 : vector<1x128x128xbf16> to vector<128x128xbf16>
    %cst_32 = arith.constant dense<0.000000e+00> : vector<2x128xf32>
    %41 = tpu.matmul %38, %40, %cst_32 {dimension_numbers = #tpu.dot_dimension_numbers<[1], [0], [0], [1], [0, 0, 1, 1], [], []>} : vector<2x128xbf16>, vector<128x128xbf16>, vector<2x128xf32> -> vector<2x128xf32>
    %42 = arith.addf %37, %41 : vector<2x128xf32>
    %c10 = arith.constant 10 : index
    %c0_33 = arith.constant 0 : index
    %43 = vector.load %arg9[%c10, %c0_33] : memref<32x128xbf16, #tpu.memory_space<vmem>>, vector<2x128xbf16>
    %c5 = arith.constant 5 : index
    %c0_34 = arith.constant 0 : index
    %c0_35 = arith.constant 0 : index
    %44 = vector.load %arg4[%c5, %c0_34, %c0_35] : memref<14x128x128xbf16, #tpu.memory_space<vmem>>, vector<1x128x128xbf16>
    %45 = vector.shape_cast %44 : vector<1x128x128xbf16> to vector<128x128xbf16>
    %cst_36 = arith.constant dense<0.000000e+00> : vector<2x128xf32>
    %46 = tpu.matmul %43, %45, %cst_36 {dimension_numbers = #tpu.dot_dimension_numbers<[1], [0], [0], [1], [0, 0, 1, 1], [], []>} : vector<2x128xbf16>, vector<128x128xbf16>, vector<2x128xf32> -> vector<2x128xf32>
    %47 = arith.addf %42, %46 : vector<2x128xf32>
    %c12 = arith.constant 12 : index
    %c0_37 = arith.constant 0 : index
    %48 = vector.load %arg9[%c12, %c0_37] : memref<32x128xbf16, #tpu.memory_space<vmem>>, vector<2x128xbf16>
    %c6_38 = arith.constant 6 : index
    %c0_39 = arith.constant 0 : index
    %c0_40 = arith.constant 0 : index
    %49 = vector.load %arg4[%c6_38, %c0_39, %c0_40] : memref<14x128x128xbf16, #tpu.memory_space<vmem>>, vector<1x128x128xbf16>
    %50 = vector.shape_cast %49 : vector<1x128x128xbf16> to vector<128x128xbf16>
    %cst_41 = arith.constant dense<0.000000e+00> : vector<2x128xf32>
    %51 = tpu.matmul %48, %50, %cst_41 {dimension_numbers = #tpu.dot_dimension_numbers<[1], [0], [0], [1], [0, 0, 1, 1], [], []>} : vector<2x128xbf16>, vector<128x128xbf16>, vector<2x128xf32> -> vector<2x128xf32>
    %52 = arith.addf %47, %51 : vector<2x128xf32>
    %c14 = arith.constant 14 : index
    %c0_42 = arith.constant 0 : index
    %53 = vector.load %arg9[%c14, %c0_42] : memref<32x128xbf16, #tpu.memory_space<vmem>>, vector<2x128xbf16>
    %c7 = arith.constant 7 : index
    %c0_43 = arith.constant 0 : index
    %c0_44 = arith.constant 0 : index
    %54 = vector.load %arg4[%c7, %c0_43, %c0_44] : memref<14x128x128xbf16, #tpu.memory_space<vmem>>, vector<1x128x128xbf16>
    %55 = vector.shape_cast %54 : vector<1x128x128xbf16> to vector<128x128xbf16>
    %cst_45 = arith.constant dense<0.000000e+00> : vector<2x128xf32>
    %56 = tpu.matmul %53, %55, %cst_45 {dimension_numbers = #tpu.dot_dimension_numbers<[1], [0], [0], [1], [0, 0, 1, 1], [], []>} : vector<2x128xbf16>, vector<128x128xbf16>, vector<2x128xf32> -> vector<2x128xf32>
    %57 = arith.addf %52, %56 : vector<2x128xf32>
    %c16 = arith.constant 16 : index
    %c0_46 = arith.constant 0 : index
    %58 = vector.load %arg9[%c16, %c0_46] : memref<32x128xbf16, #tpu.memory_space<vmem>>, vector<2x128xbf16>
    %c8_47 = arith.constant 8 : index
    %c0_48 = arith.constant 0 : index
    %c0_49 = arith.constant 0 : index
    %59 = vector.load %arg4[%c8_47, %c0_48, %c0_49] : memref<14x128x128xbf16, #tpu.memory_space<vmem>>, vector<1x128x128xbf16>
    %60 = vector.shape_cast %59 : vector<1x128x128xbf16> to vector<128x128xbf16>
    %cst_50 = arith.constant dense<0.000000e+00> : vector<2x128xf32>
    %61 = tpu.matmul %58, %60, %cst_50 {dimension_numbers = #tpu.dot_dimension_numbers<[1], [0], [0], [1], [0, 0, 1, 1], [], []>} : vector<2x128xbf16>, vector<128x128xbf16>, vector<2x128xf32> -> vector<2x128xf32>
    %62 = arith.addf %57, %61 : vector<2x128xf32>
    %c18 = arith.constant 18 : index
    %c0_51 = arith.constant 0 : index
    %63 = vector.load %arg9[%c18, %c0_51] : memref<32x128xbf16, #tpu.memory_space<vmem>>, vector<2x128xbf16>
    %c9 = arith.constant 9 : index
    %c0_52 = arith.constant 0 : index
    %c0_53 = arith.constant 0 : index
    %64 = vector.load %arg4[%c9, %c0_52, %c0_53] : memref<14x128x128xbf16, #tpu.memory_space<vmem>>, vector<1x128x128xbf16>
    %65 = vector.shape_cast %64 : vector<1x128x128xbf16> to vector<128x128xbf16>
    %cst_54 = arith.constant dense<0.000000e+00> : vector<2x128xf32>
    %66 = tpu.matmul %63, %65, %cst_54 {dimension_numbers = #tpu.dot_dimension_numbers<[1], [0], [0], [1], [0, 0, 1, 1], [], []>} : vector<2x128xbf16>, vector<128x128xbf16>, vector<2x128xf32> -> vector<2x128xf32>
    %67 = arith.addf %62, %66 : vector<2x128xf32>
    %c20 = arith.constant 20 : index
    %c0_55 = arith.constant 0 : index
    %68 = vector.load %arg9[%c20, %c0_55] : memref<32x128xbf16, #tpu.memory_space<vmem>>, vector<2x128xbf16>
    %c10_56 = arith.constant 10 : index
    %c0_57 = arith.constant 0 : index
    %c0_58 = arith.constant 0 : index
    %69 = vector.load %arg4[%c10_56, %c0_57, %c0_58] : memref<14x128x128xbf16, #tpu.memory_space<vmem>>, vector<1x128x128xbf16>
    %70 = vector.shape_cast %69 : vector<1x128x128xbf16> to vector<128x128xbf16>
    %cst_59 = arith.constant dense<0.000000e+00> : vector<2x128xf32>
    %71 = tpu.matmul %68, %70, %cst_59 {dimension_numbers = #tpu.dot_dimension_numbers<[1], [0], [0], [1], [0, 0, 1, 1], [], []>} : vector<2x128xbf16>, vector<128x128xbf16>, vector<2x128xf32> -> vector<2x128xf32>
    %72 = arith.addf %67, %71 : vector<2x128xf32>
    %c22 = arith.constant 22 : index
    %c0_60 = arith.constant 0 : index
    %73 = vector.load %arg9[%c22, %c0_60] : memref<32x128xbf16, #tpu.memory_space<vmem>>, vector<2x128xbf16>
    %c11 = arith.constant 11 : index
    %c0_61 = arith.constant 0 : index
    %c0_62 = arith.constant 0 : index
    %74 = vector.load %arg4[%c11, %c0_61, %c0_62] : memref<14x128x128xbf16, #tpu.memory_space<vmem>>, vector<1x128x128xbf16>
    %75 = vector.shape_cast %74 : vector<1x128x128xbf16> to vector<128x128xbf16>
    %cst_63 = arith.constant dense<0.000000e+00> : vector<2x128xf32>
    %76 = tpu.matmul %73, %75, %cst_63 {dimension_numbers = #tpu.dot_dimension_numbers<[1], [0], [0], [1], [0, 0, 1, 1], [], []>} : vector<2x128xbf16>, vector<128x128xbf16>, vector<2x128xf32> -> vector<2x128xf32>
    %77 = arith.addf %72, %76 : vector<2x128xf32>
    %c24 = arith.constant 24 : index
    %c0_64 = arith.constant 0 : index
    %78 = vector.load %arg9[%c24, %c0_64] : memref<32x128xbf16, #tpu.memory_space<vmem>>, vector<2x128xbf16>
    %c12_65 = arith.constant 12 : index
    %c0_66 = arith.constant 0 : index
    %c0_67 = arith.constant 0 : index
    %79 = vector.load %arg4[%c12_65, %c0_66, %c0_67] : memref<14x128x128xbf16, #tpu.memory_space<vmem>>, vector<1x128x128xbf16>
    %80 = vector.shape_cast %79 : vector<1x128x128xbf16> to vector<128x128xbf16>
    %cst_68 = arith.constant dense<0.000000e+00> : vector<2x128xf32>
    %81 = tpu.matmul %78, %80, %cst_68 {dimension_numbers = #tpu.dot_dimension_numbers<[1], [0], [0], [1], [0, 0, 1, 1], [], []>} : vector<2x128xbf16>, vector<128x128xbf16>, vector<2x128xf32> -> vector<2x128xf32>
    %82 = arith.addf %77, %81 : vector<2x128xf32>
    %c26 = arith.constant 26 : index
    %c0_69 = arith.constant 0 : index
    %83 = vector.load %arg9[%c26, %c0_69] : memref<32x128xbf16, #tpu.memory_space<vmem>>, vector<2x128xbf16>
    %c13 = arith.constant 13 : index
    %c0_70 = arith.constant 0 : index
    %c0_71 = arith.constant 0 : index
    %84 = vector.load %arg4[%c13, %c0_70, %c0_71] : memref<14x128x128xbf16, #tpu.memory_space<vmem>>, vector<1x128x128xbf16>
    %85 = vector.shape_cast %84 : vector<1x128x128xbf16> to vector<128x128xbf16>
    %cst_72 = arith.constant dense<0.000000e+00> : vector<2x128xf32>
    %86 = tpu.matmul %83, %85, %cst_72 {dimension_numbers = #tpu.dot_dimension_numbers<[1], [0], [0], [1], [0, 0, 1, 1], [], []>} : vector<2x128xbf16>, vector<128x128xbf16>, vector<2x128xf32> -> vector<2x128xf32>
    %87 = arith.addf %82, %86 : vector<2x128xf32>
    %c0_73 = arith.constant 0 : index
    %c0_74 = arith.constant 0 : index
    %88 = vector.load %arg5[%c0_73, %c0_74] : memref<1x128xf32, #tpu.memory_space<vmem>>, vector<1x128xf32>
    %89 = vector.broadcast %88 : vector<1x128xf32> to vector<2x128xf32>
    %90 = arith.addf %87, %89 : vector<2x128xf32>
    %cst_75 = arith.constant 0.000000e+00 : f32
    %91 = vector.broadcast %cst_75 : f32 to vector<2x128xf32>
    %92 = arith.maximumf %90, %91 : vector<2x128xf32>
    %c0_76 = arith.constant 0 : index
    %c0_77 = arith.constant 0 : index
    %93 = vector.load %arg6[%c0_76, %c0_77] : memref<128x128xf32, #tpu.memory_space<vmem>>, vector<128x128xf32>
    %cst_78 = arith.constant dense<0.000000e+00> : vector<2x128xf32>
    %94 = tpu.matmul %92, %93, %cst_78 {dimension_numbers = #tpu.dot_dimension_numbers<[1], [0], [0], [1], [0, 0, 1, 1], [], []>} : vector<2x128xf32>, vector<128x128xf32>, vector<2x128xf32> -> vector<2x128xf32>
    %c0_79 = arith.constant 0 : index
    %c0_80 = arith.constant 0 : index
    %95 = vector.load %arg7[%c0_79, %c0_80] : memref<1x128xf32, #tpu.memory_space<vmem>>, vector<1x128xf32>
    %96 = vector.broadcast %95 : vector<1x128xf32> to vector<2x128xf32>
    %97 = arith.addf %94, %96 : vector<2x128xf32>
    %c0_81 = arith.constant 0 : index
    %c0_82 = arith.constant 0 : index
    %98 = vector.load %arg8[%c0_81, %c0_82] : memref<2x128xf32, #tpu.memory_space<vmem>>, vector<2x128xf32>
    tpu.vector_store %arg8[%c0_81, %c0_82], %97 {strides = array<i32>} : memref<2x128xf32, #tpu.memory_space<vmem>>, vector<2x128xf32>,
    return
  }
  func.func @transform_0(%arg0: i32) -> (i32, i32) {
    %c0_i32 = arith.constant 0 : i32
    %c0_i32_0 = arith.constant 0 : i32
    %c0_i32_1 = arith.constant 0 : i32
    return %c0_i32, %c0_i32_0 : i32, i32
  }
  func.func @transform_1(%arg0: i32) -> (i32, i32) {
    %c0_i32 = arith.constant 0 : i32
    %c0_i32_0 = arith.constant 0 : i32
    %c0_i32_1 = arith.constant 0 : i32
    return %c0_i32, %c0_i32_0 : i32, i32
  }
  func.func @transform_2(%arg0: i32) -> (i32, i32) {
    %c0_i32 = arith.constant 0 : i32
    %c0_i32_0 = arith.constant 0 : i32
    %c0_i32_1 = arith.constant 0 : i32
    return %c0_i32, %c0_i32_0 : i32, i32
  }
  func.func @transform_3(%arg0: i32) -> (i32, i32, i32) {
    %c0_i32 = arith.constant 0 : i32
    %c0_i32_0 = arith.constant 0 : i32
    %c0_i32_1 = arith.constant 0 : i32
    %c0_i32_2 = arith.constant 0 : i32
    return %c0_i32, %c0_i32_0, %c0_i32_1 : i32, i32, i32
  }
  func.func @transform_4(%arg0: i32) -> (i32, i32) {
    %c0_i32 = arith.constant 0 : i32
    %c0_i32_0 = arith.constant 0 : i32
    %c0_i32_1 = arith.constant 0 : i32
    return %c0_i32, %c0_i32_0 : i32, i32
  }
  func.func @transform_5(%arg0: i32) -> (i32, i32) {
    %c0_i32 = arith.constant 0 : i32
    %c0_i32_0 = arith.constant 0 : i32
    %c0_i32_1 = arith.constant 0 : i32
    return %c0_i32, %c0_i32_0 : i32, i32
  }
  func.func @transform_6(%arg0: i32) -> (i32, i32) {
    %c0_i32 = arith.constant 0 : i32
    %c0_i32_0 = arith.constant 0 : i32
    %c0_i32_1 = arith.constant 0 : i32
    return %c0_i32, %c0_i32_0 : i32, i32
  }
  func.func @transform_7(%arg0: i32) -> (i32, i32) {
    %c0_i32 = arith.constant 0 : i32
    %c0_i32_0 = arith.constant 0 : i32
    %c0_i32_1 = arith.constant 0 : i32
    return %c0_i32, %c0_i32_0 : i32, i32
  }
}

</mosaic_0001>

<bundles_post_ra>
// kernel: tile.8
= control target key start
LH: loop header
LB: loop body
LE: loop exit
PB: predicated region body
PF: predicated region fallthrough
CT: control target
= control target key end

     0   :  { %s28_s0 = inlined_call_operand.vmem [shape: f32[6], index: 0, kind: input, shape index: {}]   ;;  %s29_s1 = inlined_call_operand.vmem [shape: f32[14,6], index: 1, kind: output, shape index: {}]  }
   0x1   :  { %v4_v0 = vld [vmem:[%s28_s0] ss:$0 sm:$0xff] }
   0x2   :  { %5 = vst [vmem:[%s29_s1] sm:$0xff] %v4_v0 }
   0x3   :  { %8 = vst [vmem:[%s29_s1 + $0x8] sm:$0xff] %v4_v0 }

// kernel: tile.9
= control target key start
LH: loop header
LB: loop body
LE: loop exit
PB: predicated region body
PF: predicated region fallthrough
CT: control target
= control target key end

     0   :  { %s115_s10 = smov 78   ;;  %s116_s11 = smov 66   ;;  %vm3_vm0 = vcmask 48128   ;;  %vm9_vm1 = vcmask 687728   ;;  %vm15_vm2 = vcmask 638528   ;;  %vm21_vm3 = vcmask 589328   ;;  %s183_s0 = inlined_call_operand.vmem [shape: f32[14,6], index: 0, kind: input, shape index: {}]   ;;  %s184_s1 = inlined_call_operand.vmem [shape: f32[84], index: 1, kind: output, shape index: {}]  }
   0x1   :  { %v89_v0 = vld [vmem:[%s183_s0 + $0xd] sm:$0x1]   ;;  %v91_v1 = vld [vmem:[%s183_s0 + $0xb] sm:$0x1]   ;;  %v93_v2 = vld [vmem:[%s183_s0 + $0x9] sm:$0x1]  }
   0x2   :  { %7 = vrot.lane.b32.xlu0 %v89_v0, %s115_s10  ;;  %19 = vrot.lane.b32.xlu1 %v91_v1, %s116_s11  ;;  %s117_s14 = smov 54   ;;  %v90_v3 = vld [vmem:[%s183_s0 + $0xc] sm:$0x1]   ;;  %v92_v4 = vld [vmem:[%s183_s0 + $0xa] sm:$0x1]   ;;  %s118_s19 = smov 72  }
   0x3   :  { %31 = vrot.lane.b32.xlu2 %v93_v2, %s117_s14  ;;  %s119_s20 = smov 60   ;;  %v94_v5 = vld [vmem:[%s183_s0 + $0x8] sm:$0x1]   ;;  %s120_s23 = smov 48   ;;  %v95_v6 = vld [vmem:[%s183_s0 + $0x7] sm:$0x1]  }
   0x4   :  { %v96_v7 = vld [vmem:[%s183_s0 + $0x6] sm:$0x1]   ;;  %s121_s28 = smov 42   ;;  %s122_s29 = smov 36   ;;  %v97_v8 = vld [vmem:[%s183_s0 + $0x5] sm:$0x1]  }
   0x5   :  { %s123_s3 = smov 30   ;;  %v98_v9 = vld [vmem:[%s183_s0 + $0x4] sm:$0x1]   ;;  %v99_v10 = vld [vmem:[%s183_s0 + $0x3] sm:$0x1]   ;;  %s124_s8 = smov 24  }
   0x6   :  { %s125_s9 = smov 18   ;;  %v100_v11 = vld [vmem:[%s183_s0 + $0x2] sm:$0x1]   ;;  %s126_s12 = smov 12   ;;  %v101_v12 = vld [vmem:[%s183_s0 + $0x1] sm:$0x1]  }
   0x7   :  { %s127_s15 = smov 6   ;;  %v2_v13 = vld [vmem:[%s183_s0] sm:$0x1]   ;;  %vm27_vm4 = vcmask 540128   ;;  %vm33_vm5 = vcmask 490928   ;;  %vm39_vm6 = vcmask 441728  }
   0x8   :  { %4 = vst.msk [vmem:[#allocation0] sm:$0x1] %vm3_vm0, %v2_v13   ;;  %vm45_vm7 = vcmask 392528   ;;  %vm51_vm8 = vcmask 343328   ;;  %vm57_vm9 = vcmask 294128   ;;  %vm63_vm10 = vcmask 244928  }
   0x9   :  { %vm69_vm11 = vcmask 195728   ;;  %vm75_vm12 = vcmask 146528   ;;  %vm81_vm13 = vcmask 97328  }
   0xa   :  { %13 = vrot.lane.b32.xlu0 %v90_v3, %s118_s19  ;;  %25 = vrot.lane.b32.xlu1 %v92_v4, %s119_s20 }
   0xb   :  { %37 = vrot.lane.b32.xlu2 %v94_v5, %s120_s23 }
  0x12   :  { %43 = vrot.lane.b32.xlu0 %v95_v6, %s121_s28  ;;  %49 = vrot.lane.b32.xlu1 %v96_v7, %s122_s29 }
  0x13   :  { %55 = vrot.lane.b32.xlu2 %v97_v8, %s123_s3 }
  0x1a   :  { %61 = vrot.lane.b32.xlu0 %v98_v9, %s124_s8  ;;  %67 = vrot.lane.b32.xlu1 %v99_v10, %s125_s9 }
  0x1b   :  { %73 = vrot.lane.b32.xlu2 %v100_v11, %s126_s12 }
  0x22   :  { %79 = vrot.lane.b32.xlu0 %v101_v12, %s127_s15 }
  0x5d   :  { %v32_v14 = vpop.permute.xlu2 %31  }
  0x65   :  { %v38_v15 = vpop.permute.xlu2 %37  }
  0x6d   :  { %v56_v16 = vpop.permute.xlu2 %55  }
  0x74   :  { %v8_v17 = vpop.permute.xlu0 %7   ;;  %v20_v18 = vpop.permute.xlu1 %19  }
  0x75   :  { %10 = vst.msk [vmem:[#allocation0] sm:$0x1] %vm9_vm1, %v8_v17   ;;  %v74_v19 = vpop.permute.xlu2 %73  }
  0x7c   :  { %v14_v20 = vpop.permute.xlu0 %13   ;;  %v26_v21 = vpop.permute.xlu1 %25  }
  0x7d   :  { %16 = vst.msk [vmem:[#allocation0] sm:$0x1] %vm15_vm2, %v14_v20  }
  0x7e   :  { %22 = vst.msk [vmem:[#allocation0] sm:$0x1] %vm21_vm3, %v20_v18  }
  0x7f   :  { %28 = vst.msk [vmem:[#allocation0] sm:$0x1] %vm27_vm4, %v26_v21  }
  0x80   :  { %34 = vst.msk [vmem:[#allocation0] sm:$0x1] %vm33_vm5, %v32_v14  }
  0x81   :  { %40 = vst.msk [vmem:[#allocation0] sm:$0x1] %vm39_vm6, %v38_v15  }
  0x84   :  { %v44_v22 = vpop.permute.xlu0 %43   ;;  %v50_v23 = vpop.permute.xlu1 %49  }
  0x85   :  { %46 = vst.msk [vmem:[#allocation0] sm:$0x1] %vm45_vm7, %v44_v22  }
  0x86   :  { %52 = vst.msk [vmem:[#allocation0] sm:$0x1] %vm51_vm8, %v50_v23  }
  0x87   :  { %58 = vst.msk [vmem:[#allocation0] sm:$0x1] %vm57_vm9, %v56_v16  }
  0x8c   :  { %v62_v24 = vpop.permute.xlu0 %61   ;;  %v68_v25 = vpop.permute.xlu1 %67  }
  0x8d   :  { %64 = vst.msk [vmem:[#allocation0] sm:$0x1] %vm63_vm10, %v62_v24  }
  0x8e   :  { %70 = vst.msk [vmem:[#allocation0] sm:$0x1] %vm69_vm11, %v68_v25  }
  0x8f   :  { %76 = vst.msk [vmem:[#allocation0] sm:$0x1] %vm75_vm12, %v74_v19  }
  0x94   :  { %v80_v26 = vpop.permute.xlu0 %79  }
  0x95   :  { %82 = vst.msk [vmem:[#allocation0] sm:$0x1] %vm81_vm13, %v80_v26  }
  0x9c   :  { %v85_v27 = vld [vmem:[#allocation0] sm:$0x1] }
  0x9d   :  { %88 = vst [vmem:[%s184_s1] sm:$0x1] %v85_v27 }

// kernel: cnn_forward.1
= control target key start
LH: loop header
LB: loop body
LE: loop exit
PB: predicated region body
PF: predicated region fallthrough
CT: control target
= control target key end

     0   :  { %s5586_s0 = inlined_call_operand.vmem [shape: bf16[128,1152], index: 0, kind: input, shape index: {}]   ;;  %s5587_s1 = inlined_call_operand.vmem [shape: bf16[1152,128], index: 1, kind: input, shape index: {}]   ;;  %s5588_s2 = inlined_call_operand.vmem [shape: f32[1,128], index: 2, kind: input, shape index: {}]   ;;  %s5589_s3 = inlined_call_operand.vmem [shape: bf16[14,128,128], index: 3, kind: input, shape index: {}]   ;;  %s5590_s4 = inlined_call_operand.vmem [shape: f32[1,128], index: 4, kind: input, shape index: {}]   ;;  %s5591_s5 = inlined_call_operand.vmem [shape: f32[128,128], index: 5, kind: input, shape index: {}]   ;;  %s5592_s6 = inlined_call_operand.vmem [shape: f32[1,128], index: 6, kind: input, shape index: {}]   ;;  %s5593_s7 = inlined_call_operand.hbm [shape: f32[2,128], index: 7, kind: output, shape index: {}]  }
   0x1   :  { %v4073_v0 = vld [vmem:[%s5587_s1 + $0x38] sm:$0xff]  ;;  %v4072_v4 = vld [vmem:[%s5587_s1 + $0x30] sm:$0xff]  ;;  %v4071_v8 = vld [vmem:[%s5587_s1 + $0x28] sm:$0xff] }
   0x2   :  { %v4089_v1 = vld [vmem:[%s5587_s1 + $0xb8] sm:$0xff]  ;;  %1055 = vmatpush.bf16.msra.mxu0 %v4073_v0  ;;  %v4088_v5 = vld [vmem:[%s5587_s1 + $0xb0] sm:$0xff]  ;;  %v4087_v9 = vld [vmem:[%s5587_s1 + $0xa8] sm:$0xff] }
   0x3   :  { %v4081_v2 = vld [vmem:[%s5587_s1 + $0x78] sm:$0xff]  ;;  %1153 = vmatpush.bf16.msra.mxu2 %v4089_v1  ;;  %v4080_v6 = vld [vmem:[%s5587_s1 + $0x70] sm:$0xff]  ;;  %v4079_v10 = vld [vmem:[%s5587_s1 + $0x68] sm:$0xff] }
   0x4   :  { %v4097_v3 = vld [vmem:[%s5587_s1 + $0xf8] sm:$0xff]  ;;  %1104 = vmatpush.bf16.msra.mxu1 %v4081_v2  ;;  %v4096_v7 = vld [vmem:[%s5587_s1 + $0xf0] sm:$0xff]  ;;  %v4095_v11 = vld [vmem:[%s5587_s1 + $0xe8] sm:$0xff] }
   0x5   :  { %1202 = vmatpush.bf16.msra.mxu3 %v4097_v3  ;;  %v4070_v12 = vld [vmem:[%s5587_s1 + $0x20] sm:$0xff]  ;;  %v4069_v16 = vld [vmem:[%s5587_s1 + $0x18] sm:$0xff] }
   0x6   :  { %1056 = vmatpush.bf16.msra.mxu0 %v4072_v4  ;;  %v4086_v13 = vld [vmem:[%s5587_s1 + $0xa0] sm:$0xff]  ;;  %v4085_v17 = vld [vmem:[%s5587_s1 + $0x98] sm:$0xff] }
   0x7   :  { %1154 = vmatpush.bf16.msra.mxu2 %v4088_v5  ;;  %v4078_v14 = vld [vmem:[%s5587_s1 + $0x60] sm:$0xff]  ;;  %v4077_v18 = vld [vmem:[%s5587_s1 + $0x58] sm:$0xff] }
   0x8   :  { %1105 = vmatpush.bf16.msra.mxu1 %v4080_v6  ;;  %v4094_v15 = vld [vmem:[%s5587_s1 + $0xe0] sm:$0xff]  ;;  %v4093_v19 = vld [vmem:[%s5587_s1 + $0xd8] sm:$0xff] }
   0x9   :  { %1203 = vmatpush.bf16.msra.mxu3 %v4096_v7 }
   0xa   :  { %1057 = vmatpush.bf16.msra.mxu0 %v4071_v8 }
   0xb   :  { %1155 = vmatpush.bf16.msra.mxu2 %v4087_v9 }
   0xc   :  { %1106 = vmatpush.bf16.msra.mxu1 %v4079_v10 }
   0xd   :  { %1204 = vmatpush.bf16.msra.mxu3 %v4095_v11 }
   0xe   :  { %1058 = vmatpush.bf16.msra.mxu0 %v4070_v12 }
   0xf   :  { %1156 = vmatpush.bf16.msra.mxu2 %v4086_v13 }
  0x10   :  { %1107 = vmatpush.bf16.msra.mxu1 %v4078_v14 }
  0x11   :  { %1205 = vmatpush.bf16.msra.mxu3 %v4094_v15 }
  0x12   :  { %12 = vsyncpa [#allocation4], 0  ;;  %1059 = vmatpush.bf16.msra.mxu0 %v4069_v16  ;;  %v4068_v20 = vld [vmem:[%s5587_s1 + $0x10] sm:$0xff]  ;;  %v4067_v24 = vld [vmem:[%s5587_s1 + $0x8] sm:$0xff]  ;;  %s4291_s9 = smov [#allocation3]  }
  0x13   :  { %1157 = vmatpush.bf16.msra.mxu2 %v4085_v17  ;;  %v4084_v21 = vld [vmem:[%s5587_s1 + $0x90] sm:$0xff]  ;;  %v4083_v25 = vld [vmem:[%s5587_s1 + $0x88] sm:$0xff]  ;;  %v4066_v28 = vld [vmem:[%s5587_s1] sm:$0xff]  ;;  %s2751_s10 = sshll.u32 %s4291_s9, 4  ;;  %s2752_s10 = int_to_ptr.vmem [resolvable:$true] %s2751_s10 }
  0x14   :  { %1108 = vmatpush.bf16.msra.mxu1 %v4077_v18  ;;  %v4076_v22 = vld [vmem:[%s5587_s1 + $0x50] sm:$0xff]  ;;  %v4075_v26 = vld [vmem:[%s5587_s1 + $0x48] sm:$0xff]  ;;  %v4082_v29 = vld [vmem:[%s5587_s1 + $0x80] sm:$0xff] }
  0x15   :  { %1206 = vmatpush.bf16.msra.mxu3 %v4093_v19  ;;  %v4092_v23 = vld [vmem:[%s5587_s1 + $0xd0] sm:$0xff]  ;;  %v4091_v27 = vld [vmem:[%s5587_s1 + $0xc8] sm:$0xff]  ;;  %v4074_v30 = vld [vmem:[%s5587_s1 + $0x40] sm:$0xff] }
  0x16   :  { %1060 = vmatpush.bf16.msra.mxu0 %v4068_v20  ;;  %v4090_v31 = vld [vmem:[%s5587_s1 + $0xc0] sm:$0xff]  ;;  %v2772_v34 = vld [vmem:[%s5586_s0 + $0x8] sm:$0xf]  ;;  %v3999_v35 = vld [vmem:[%s5586_s0 + $0x28] sm:$0xf0] }
  0x17   :  { %1158 = vmatpush.bf16.msra.mxu2 %v4084_v21  ;;  %v2764_v32 = vld [vmem:[%s5586_s0] sm:$0xf]  ;;  %v3998_v33 = vld [vmem:[%s5586_s0 + $0x20] sm:$0xf0]  ;;  %v2766_v37 = vld [vmem:[%s5586_s0 + $0x24] sm:$0xf0]  ;;  %v2773_v42 = vor.u32 %v3999_v35, %v2772_v34 }
  0x18   :  { %1109 = vmatpush.bf16.msra.mxu1 %v4076_v22  ;;  %v3994_v36 = vld [vmem:[%s5586_s0 + $0x4] sm:$0xf]  ;;  %v3995_v38 = vld [vmem:[%s5586_s0 + $0xc] sm:$0xf]  ;;  %v2774_v39 = vld [vmem:[%s5586_s0 + $0x2c] sm:$0xf0]  ;;  %v2765_v41 = vor.u32 %v3998_v33, %v2764_v32 }
  0x19   :  { %1207 = vmatpush.bf16.msra.mxu3 %v4092_v23  ;;  %v4105_v40 = vld [vmem:[%s5587_s1 + $0x138] sm:$0xff]  ;;  %v2769_v43 = vor.u32 %v3994_v36, %v2766_v37  ;;  %v2777_v44 = vor.u32 %v3995_v38, %v2774_v39  ;;  %v4104_v45 = vld [vmem:[%s5587_s1 + $0x130] sm:$0xff]  ;;  %v2800_v46 = vld [vmem:[%s5586_s0 + $0x48] sm:$0xf] }
  0x1a   :  { %1061 = vmatpush.bf16.msra.mxu0 %v4067_v24  ;;  %v4007_v47 = vld [vmem:[%s5586_s0 + $0x68] sm:$0xf0]  ;;  %v2808_v48 = vld [vmem:[%s5586_s0 + $0x50] sm:$0xf]  ;;  %v4008_v49 = vld [vmem:[%s5586_s0 + $0x70] sm:$0xf0] }
  0x1b   :  { %1159 = vmatpush.bf16.msra.mxu2 %v4083_v25  ;;  %v4003_v50 = vld [vmem:[%s5586_s0 + $0x4c] sm:$0xf]  ;;  %v2802_v51 = vld [vmem:[%s5586_s0 + $0x6c] sm:$0xf0]  ;;  %v4004_v52 = vld [vmem:[%s5586_s0 + $0x54] sm:$0xf]  ;;  %v2801_v54 = vor.u32 %v4007_v47, %v2800_v46  ;;  %v2809_v55 = vor.u32 %v4008_v49, %v2808_v48 }
  0x1c   :  { %1110 = vmatpush.bf16.msra.mxu1 %v4075_v26  ;;  %v2810_v53 = vld [vmem:[%s5586_s0 + $0x74] sm:$0xf0]  ;;  %v2805_v56 = vor.u32 %v4003_v50, %v2802_v51  ;;  %v4103_v58 = vld [vmem:[%s5587_s1 + $0x128] sm:$0xff]  ;;  %v2836_v59 = vld [vmem:[%s5586_s0 + $0x90] sm:$0xf] }
  0x1d   :  { %1208 = vmatpush.bf16.msra.mxu3 %v4091_v27  ;;  %v2813_v57 = vor.u32 %v4004_v52, %v2810_v53  ;;  %v4016_v60 = vld [vmem:[%s5586_s0 + $0xb0] sm:$0xf0]  ;;  %v2844_v61 = vld [vmem:[%s5586_s0 + $0x98] sm:$0xf]  ;;  %v4017_v62 = vld [vmem:[%s5586_s0 + $0xb8] sm:$0xf0] }
  0x1e   :  { %1062 = vmatpush.bf16.msra.mxu0 %v4066_v28  ;;  %v4012_v63 = vld [vmem:[%s5586_s0 + $0x94] sm:$0xf]  ;;  %v2838_v0 = vld [vmem:[%s5586_s0 + $0xb4] sm:$0xf0]  ;;  %v4013_v1 = vld [vmem:[%s5586_s0 + $0x9c] sm:$0xf]  ;;  %v2837_v3 = vor.u32 %v4016_v60, %v2836_v59  ;;  %v2845_v4 = vor.u32 %v4017_v62, %v2844_v61 }
  0x1f   :  { %1160 = vmatpush.bf16.msra.mxu2 %v4082_v29  ;;  %v2846_v2 = vld [vmem:[%s5586_s0 + $0xbc] sm:$0xf0]  ;;  %v2841_v5 = vor.u32 %v4012_v63, %v2838_v0  ;;  %v2872_v8 = vld [vmem:[%s5586_s0 + $0xd8] sm:$0xf]  ;;  %v4025_v9 = vld [vmem:[%s5586_s0 + $0xf8] sm:$0xf0] }
  0x20   :  { %1111 = vmatpush.bf16.msra.mxu1 %v4074_v30  ;;  %v2849_v6 = vor.u32 %v4013_v1, %v2846_v2  ;;  %v4102_v7 = vld [vmem:[%s5587_s1 + $0x120] sm:$0xff]  ;;  %v4021_v12 = vld [vmem:[%s5586_s0 + $0xdc] sm:$0xf]  ;;  %v2882_v15 = vld [vmem:[%s5586_s0 + $0x104] sm:$0xf0]  ;;  %v2873_v16 = vor.u32 %v4025_v9, %v2872_v8 }
  0x21   :  { %1209 = vmatpush.bf16.msra.mxu3 %v4090_v31  ;;  %1063 = vmatmul.bf16.vlgmr.msra.gmra.mxu0 %v2765_v41  ;;  %v2880_v10 = vld [vmem:[%s5586_s0 + $0xe0] sm:$0xf]  ;;  %v4026_v11 = vld [vmem:[%s5586_s0 + $0x100] sm:$0xf0]  ;;  %v4101_v20 = vld [vmem:[%s5587_s1 + $0x118] sm:$0xff] }
  0x22   :  { %1251 = vmatpush.bf16.msrb.mxu0 %v4105_v40  ;;  %1161 = vmatmul.bf16.vlgmr.msra.gmra.mxu2 %v2773_v42  ;;  %v2874_v13 = vld [vmem:[%s5586_s0 + $0xfc] sm:$0xf0]  ;;  %v4022_v14 = vld [vmem:[%s5586_s0 + $0xe4] sm:$0xf]  ;;  %v2881_v17 = vor.u32 %v4026_v11, %v2880_v10  ;;  %v2916_v23 = vld [vmem:[%s5586_s0 + $0x128] sm:$0xf] }
  0x23   :  { %1112 = vmatmul.bf16.vlgmr.msra.gmra.mxu1 %v2769_v43  ;;  %v2877_v18 = vor.u32 %v4021_v12, %v2874_v13  ;;  %v2885_v19 = vor.u32 %v4022_v14, %v2882_v15  ;;  %v2908_v21 = vld [vmem:[%s5586_s0 + $0x120] sm:$0xf]  ;;  %v4034_v22 = vld [vmem:[%s5586_s0 + $0x140] sm:$0xf0]  ;;  %v4035_v24 = vld [vmem:[%s5586_s0 + $0x148] sm:$0xf0] }
  0x24   :  { %1210 = vmatmul.bf16.vlgmr.msra.gmra.mxu3 %v2777_v44  ;;  %v4030_v25 = vld [vmem:[%s5586_s0 + $0x124] sm:$0xf]  ;;  %v2910_v26 = vld [vmem:[%s5586_s0 + $0x144] sm:$0xf0]  ;;  %v4031_v27 = vld [vmem:[%s5586_s0 + $0x12c] sm:$0xf]  ;;  %v2909_v29 = vor.u32 %v4034_v22, %v2908_v21  ;;  %v2917_v30 = vor.u32 %v4035_v24, %v2916_v23 }
  0x25   :  { %v2918_v28 = vld [vmem:[%s5586_s0 + $0x14c] sm:$0xf0]  ;;  %v2913_v31 = vor.u32 %v4030_v25, %v2910_v26  ;;  %v4121_v33 = vld [vmem:[%s5587_s1 + $0x1b8] sm:$0xff]  ;;  %v4119_v40 = vld [vmem:[%s5587_s1 + $0x1a8] sm:$0xff] }
  0x26   :  { %1252 = vmatpush.bf16.msrb.mxu0 %v4104_v45  ;;  %v2921_v32 = vor.u32 %v4031_v27, %v2918_v28  ;;  %v4113_v34 = vld [vmem:[%s5587_s1 + $0x178] sm:$0xff]  ;;  %1349 = vmatpush.bf16.msrb.mxu2 %v4121_v33  ;;  %v4120_v36 = vld [vmem:[%s5587_s1 + $0x1b0] sm:$0xff]  ;;  %v4111_v41 = vld [vmem:[%s5587_s1 + $0x168] sm:$0xff] }
  0x27   :  { %v4129_v35 = vld [vmem:[%s5587_s1 + $0x1f8] sm:$0xff]  ;;  %v4100_v37 = vld [vmem:[%s5587_s1 + $0x110] sm:$0xff]  ;;  %1300 = vmatpush.bf16.msrb.mxu1 %v4113_v34  ;;  %v4127_v42 = vld [vmem:[%s5587_s1 + $0x1e8] sm:$0xff] }
  0x28   :  { %1398 = vmatpush.bf16.msrb.mxu3 %v4129_v35  ;;  %v4112_v38 = vld [vmem:[%s5587_s1 + $0x170] sm:$0xff]  ;;  %v2944_v43 = vld [vmem:[%s5586_s0 + $0x168] sm:$0xf]  ;;  %v4043_v44 = vld [vmem:[%s5586_s0 + $0x188] sm:$0xf0] }
  0x29   :  { %v4128_v39 = vld [vmem:[%s5587_s1 + $0x1f0] sm:$0xff]  ;;  %v4039_v47 = vld [vmem:[%s5586_s0 + $0x16c] sm:$0xf]  ;;  %v2954_v50 = vld [vmem:[%s5586_s0 + $0x194] sm:$0xf0] }
  0x2a   :  { %1253 = vmatpush.bf16.msrb.mxu0 %v4103_v58  ;;  %1350 = vmatpush.bf16.msrb.mxu2 %v4120_v36  ;;  %v2952_v45 = vld [vmem:[%s5586_s0 + $0x170] sm:$0xf]  ;;  %v4044_v46 = vld [vmem:[%s5586_s0 + $0x190] sm:$0xf0]  ;;  %v4118_v51 = vld [vmem:[%s5587_s1 + $0x1a0] sm:$0xff] }
  0x2b   :  { %1301 = vmatpush.bf16.msrb.mxu1 %v4112_v38  ;;  %v2946_v48 = vld [vmem:[%s5586_s0 + $0x18c] sm:$0xf0]  ;;  %v4040_v49 = vld [vmem:[%s5586_s0 + $0x174] sm:$0xf]  ;;  %v4110_v52 = vld [vmem:[%s5587_s1 + $0x160] sm:$0xff] }
  0x2c   :  { %1399 = vmatpush.bf16.msrb.mxu3 %v4128_v39  ;;  %v4126_v53 = vld [vmem:[%s5587_s1 + $0x1e0] sm:$0xff]  ;;  %v4117_v58 = vld [vmem:[%s5587_s1 + $0x198] sm:$0xff]  ;;  %v4116_v61 = vld [vmem:[%s5587_s1 + $0x190] sm:$0xff] }
  0x2d   :  { %v4109_v59 = vld [vmem:[%s5587_s1 + $0x158] sm:$0xff]  ;;  %v4099_v62 = vld [vmem:[%s5587_s1 + $0x108] sm:$0xff]  ;;  %v4108_v63 = vld [vmem:[%s5587_s1 + $0x150] sm:$0xff] }
  0x2e   :  { %1254 = vmatpush.bf16.msrb.mxu0 %v4102_v7  ;;  %1351 = vmatpush.bf16.msrb.mxu2 %v4119_v40  ;;  %v4125_v60 = vld [vmem:[%s5587_s1 + $0x1d8] sm:$0xff]  ;;  %v4124_v0 = vld [vmem:[%s5587_s1 + $0x1d0] sm:$0xff]  ;;  %v4115_v1 = vld [vmem:[%s5587_s1 + $0x188] sm:$0xff] }
  0x2f   :  { %1302 = vmatpush.bf16.msrb.mxu1 %v4111_v41  ;;  %v4107_v2 = vld [vmem:[%s5587_s1 + $0x148] sm:$0xff]  ;;  %v4053_v7 = vld [vmem:[%s5586_s0 + $0x1d8] sm:$0xf0]  ;;  %v4048_v8 = vld [vmem:[%s5586_s0 + $0x1b4] sm:$0xf] }
  0x30   :  { %1400 = vmatpush.bf16.msrb.mxu3 %v4127_v42  ;;  %v2982_v9 = vld [vmem:[%s5586_s0 + $0x1d4] sm:$0xf0]  ;;  %v4049_v10 = vld [vmem:[%s5586_s0 + $0x1bc] sm:$0xf]  ;;  %v2990_v11 = vld [vmem:[%s5586_s0 + $0x1dc] sm:$0xf0] }
  0x31   :  { %1068 = vmatmul.bf16.gmra.mxu0 %v2801_v54  ;;  %v2945_v54 = vor.u32 %v4043_v44, %v2944_v43  ;;  %v4098_v12 = vld [vmem:[%s5587_s1 + $0x100] sm:$0xff]  ;;  %v4061_v21 = vld [vmem:[%s5586_s0 + $0x218] sm:$0xf0]  ;;  %v3026_v27 = vld [vmem:[%s5586_s0 + $0x224] sm:$0xf0] }
  0x32   :  { %1166 = vmatmul.bf16.gmra.mxu2 %v2809_v55  ;;  %1255 = vmatpush.bf16.msrb.mxu0 %v4101_v20  ;;  %v2953_v55 = vor.u32 %v4044_v46, %v2952_v45  ;;  %v4114_v13 = vld [vmem:[%s5587_s1 + $0x180] sm:$0xff]  ;;  %v3016_v20 = vld [vmem:[%s5586_s0 + $0x1f8] sm:$0xf]  ;;  %v4057_v24 = vld [vmem:[%s5586_s0 + $0x1fc] sm:$0xf] }
  0x33   :  { %1117 = vmatmul.bf16.gmra.mxu1 %v2805_v56  ;;  %v2949_v56 = vor.u32 %v4039_v47, %v2946_v48  ;;  %1352 = vmatpush.bf16.msrb.mxu2 %v4118_v51  ;;  %v3024_v22 = vld [vmem:[%s5586_s0 + $0x200] sm:$0xf]  ;;  %v4062_v23 = vld [vmem:[%s5586_s0 + $0x220] sm:$0xf0]  ;;  %v3017_v28 = vor.u32 %v4061_v21, %v3016_v20  ;;  %v2780_v33 = vld [vmem:[%s5586_s0 + $0x10] sm:$0xf] }
  0x34   :  { %1215 = vmatmul.bf16.gmra.mxu3 %v2813_v57  ;;  %v2957_v57 = vor.u32 %v4040_v49, %v2954_v50  ;;  %1303 = vmatpush.bf16.msrb.mxu1 %v4110_v52  ;;  %v3018_v25 = vld [vmem:[%s5586_s0 + $0x21c] sm:$0xf0]  ;;  %v4058_v26 = vld [vmem:[%s5586_s0 + $0x204] sm:$0xf]  ;;  %v4000_v34 = vld [vmem:[%s5586_s0 + $0x30] sm:$0xf0] }
  0x35   :  { %1401 = vmatpush.bf16.msrb.mxu3 %v4126_v53  ;;  %v4137_v35 = vld [vmem:[%s5587_s1 + $0x238] sm:$0xff]  ;;  %v3996_v38 = vld [vmem:[%s5586_s0 + $0x14] sm:$0xf]  ;;  %v2790_v41 = vld [vmem:[%s5586_s0 + $0x3c] sm:$0xf0]  ;;  %v2781_v42 = vor.u32 %v4000_v34, %v2780_v33 }
  0x36   :  { %1256 = vmatpush.bf16.msrb.mxu0 %v4100_v37  ;;  %v2788_v36 = vld [vmem:[%s5586_s0 + $0x18] sm:$0xf]  ;;  %v4001_v37 = vld [vmem:[%s5586_s0 + $0x38] sm:$0xf0] }
  0x37   :  { %1353 = vmatpush.bf16.msrb.mxu2 %v4117_v58  ;;  %v2782_v39 = vld [vmem:[%s5586_s0 + $0x34] sm:$0xf0]  ;;  %v3997_v40 = vld [vmem:[%s5586_s0 + $0x1c] sm:$0xf]  ;;  %v2789_v43 = vor.u32 %v4001_v37, %v2788_v36 }
  0x38   :  { %1304 = vmatpush.bf16.msrb.mxu1 %v4109_v59  ;;  %v2785_v45 = vor.u32 %v3996_v38, %v2782_v39  ;;  %v2793_v46 = vor.u32 %v3997_v40, %v2790_v41  ;;  %v2816_v58 = vld [vmem:[%s5586_s0 + $0x58] sm:$0xf]  ;;  %v4009_v59 = vld [vmem:[%s5586_s0 + $0x78] sm:$0xf0] }
  0x39   :  { %1402 = vmatpush.bf16.msrb.mxu3 %v4125_v60  ;;  %v4136_v60 = vld [vmem:[%s5587_s1 + $0x230] sm:$0xff] }
  0x3a   :  { %1257 = vmatpush.bf16.msrb.mxu0 %v4099_v62  ;;  %v4010_v62 = vld [vmem:[%s5586_s0 + $0x80] sm:$0xf0] }
  0x3b   :  { %1354 = vmatpush.bf16.msrb.mxu2 %v4116_v61  ;;  %v2824_v61 = vld [vmem:[%s5586_s0 + $0x60] sm:$0xf] }
  0x3c   :  { %1305 = vmatpush.bf16.msrb.mxu1 %v4108_v63  ;;  %v4005_v63 = vld [vmem:[%s5586_s0 + $0x5c] sm:$0xf] }
  0x3d   :  { %1403 = vmatpush.bf16.msrb.mxu3 %v4124_v0  ;;  %v2818_v0 = vld [vmem:[%s5586_s0 + $0x7c] sm:$0xf0] }
  0x3e   :  { %1258 = vmatpush.bf16.msrb.mxu0 %v4098_v12 }
  0x3f   :  { %1355 = vmatpush.bf16.msrb.mxu2 %v4115_v1  ;;  %v4006_v1 = vld [vmem:[%s5586_s0 + $0x64] sm:$0xf] }
  0x40   :  { %1306 = vmatpush.bf16.msrb.mxu1 %v4107_v2  ;;  %v2826_v2 = vld [vmem:[%s5586_s0 + $0x84] sm:$0xf0] }
  0x41   :  { %1073 = vmatmul.bf16.gmra.mxu0 %v2837_v3  ;;  %v4123_v3 = vld [vmem:[%s5587_s1 + $0x1c8] sm:$0xff] }
  0x42   :  { %1171 = vmatmul.bf16.gmra.mxu2 %v2845_v4  ;;  %v2980_v4 = vld [vmem:[%s5586_s0 + $0x1b0] sm:$0xf]  ;;  %1404 = vmatpush.bf16.msrb.mxu3 %v4123_v3 }
  0x43   :  { %1122 = vmatmul.bf16.gmra.mxu1 %v2841_v5  ;;  %v4052_v5 = vld [vmem:[%s5586_s0 + $0x1d0] sm:$0xf0]  ;;  %1356 = vmatpush.bf16.msrb.mxu2 %v4114_v13 }
  0x44   :  { %1220 = vmatmul.bf16.gmra.mxu3 %v2849_v6  ;;  %v2988_v6 = vld [vmem:[%s5586_s0 + $0x1b8] sm:$0xf]  ;;  %v2981_v14 = vor.u32 %v4052_v5, %v2980_v4  ;;  %1447 = vmatpush.bf16.msra.mxu0 %v4137_v35 }
  0x45   :  { %v2989_v15 = vor.u32 %v4053_v7, %v2988_v6  ;;  %v2817_v6 = vor.u32 %v4009_v59, %v2816_v58  ;;  %v2825_v7 = vor.u32 %v4010_v62, %v2824_v61  ;;  %v4028_v58 = vld [vmem:[%s5586_s0 + $0x110] sm:$0xf0]  ;;  %v4023_v59 = vld [vmem:[%s5586_s0 + $0xec] sm:$0xf]  ;;  %v2898_v62 = vld [vmem:[%s5586_s0 + $0x114] sm:$0xf0] }
  0x46   :  { %v4024_v61 = vld [vmem:[%s5586_s0 + $0xf4] sm:$0xf] }
  0x48   :  { %1448 = vmatpush.bf16.msra.mxu0 %v4136_v60  ;;  %v2890_v60 = vld [vmem:[%s5586_s0 + $0x10c] sm:$0xf0] }
  0x51   :  { %1078 = vmatmul.bf16.gmra.mxu0 %v2873_v16  ;;  %v2985_v16 = vor.u32 %v4048_v8, %v2982_v9  ;;  %v2821_v9 = vor.u32 %v4005_v63, %v2818_v0 }
  0x52   :  { %1176 = vmatmul.bf16.gmra.mxu2 %v2881_v17  ;;  %v2993_v17 = vor.u32 %v4049_v10, %v2990_v11  ;;  %v2829_v10 = vor.u32 %v4006_v1, %v2826_v2 }
  0x53   :  { %1127 = vmatmul.bf16.gmra.mxu1 %v2877_v18  ;;  %v4106_v18 = vld [vmem:[%s5587_s1 + $0x140] sm:$0xff] }
  0x54   :  { %1225 = vmatmul.bf16.gmra.mxu3 %v2885_v19  ;;  %v4122_v19 = vld [vmem:[%s5587_s1 + $0x1c0] sm:$0xff]  ;;  %1307 = vmatpush.bf16.msrb.mxu1 %v4106_v18 }
  0x55   :  { %1405 = vmatpush.bf16.msrb.mxu3 %v4122_v19 }
  0x61   :  { %1083 = vmatmul.bf16.gmra.mxu0 %v2909_v29  ;;  %v3025_v29 = vor.u32 %v4062_v23, %v3024_v22  ;;  %v2852_v23 = vld [vmem:[%s5586_s0 + $0xa0] sm:$0xf] }
  0x62   :  { %1181 = vmatmul.bf16.gmra.mxu2 %v2917_v30  ;;  %v3021_v30 = vor.u32 %v4057_v24, %v3018_v25  ;;  %v4018_v24 = vld [vmem:[%s5586_s0 + $0xc0] sm:$0xf0]  ;;  %v4135_v25 = vld [vmem:[%s5587_s1 + $0x228] sm:$0xff] }
  0x63   :  { %1132 = vmatmul.bf16.gmra.mxu1 %v2913_v31  ;;  %v3029_v31 = vor.u32 %v4058_v26, %v3026_v27  ;;  %v2860_v26 = vld [vmem:[%s5586_s0 + $0xa8] sm:$0xf]  ;;  %v4019_v27 = vld [vmem:[%s5586_s0 + $0xc8] sm:$0xf0]  ;;  %1449 = vmatpush.bf16.msra.mxu0 %v4135_v25  ;;  %v2853_v36 = vor.u32 %v4018_v24, %v2852_v23  ;;  %v4133_v23 = vld [vmem:[%s5587_s1 + $0x218] sm:$0xff] }
  0x64   :  { %1230 = vmatmul.bf16.gmra.mxu3 %v2921_v32  ;;  %v4719_v32 = vld [vmem:[%s5588_s2] ss:$0 sm:$0xff]  ;;  %v2861_v37 = vor.u32 %v4019_v27, %v2860_v26  ;;  %v2932_v24 = vld [vmem:[%s5586_s0 + $0x138] sm:$0xf]  ;;  %v4037_v25 = vld [vmem:[%s5586_s0 + $0x158] sm:$0xf0] }
  0x65   :  { %v4032_v26 = vld [vmem:[%s5586_s0 + $0x134] sm:$0xf]  ;;  %v2926_v27 = vld [vmem:[%s5586_s0 + $0x154] sm:$0xf0] }
  0x71   :  { %1088 = vmatmul.bf16.gmra.mxu0 %v2945_v54 }
  0x72   :  { %1186 = vmatmul.bf16.gmra.mxu2 %v2953_v55 }
  0x73   :  { %1137 = vmatmul.bf16.gmra.mxu1 %v2949_v56 }
  0x74   :  { %1235 = vmatmul.bf16.gmra.mxu3 %v2957_v57 }
  0x81   :  { %1093 = vmatmul.bf16.gmra.mxu0 %v2981_v14 }
  0x82   :  { %1191 = vmatmul.bf16.gmra.mxu2 %v2989_v15 }
  0x83   :  { %1142 = vmatmul.bf16.gmra.mxu1 %v2985_v16 }
  0x84   :  { %1240 = vmatmul.bf16.gmra.mxu3 %v2993_v17 }
  0x91   :  { %1098 = vmatmul.bf16.gmra.mxu0 %v3017_v28  ;;  %v4014_v28 = vld [vmem:[%s5586_s0 + $0xa4] sm:$0xf] }
  0x92   :  { %1196 = vmatmul.bf16.gmra.mxu2 %v3025_v29  ;;  %v2854_v29 = vld [vmem:[%s5586_s0 + $0xc4] sm:$0xf0] }
  0x93   :  { %1147 = vmatmul.bf16.gmra.mxu1 %v3021_v30  ;;  %v4015_v30 = vld [vmem:[%s5586_s0 + $0xac] sm:$0xf]  ;;  %v2857_v39 = vor.u32 %v4014_v28, %v2854_v29  ;;  %v4033_v28 = vld [vmem:[%s5586_s0 + $0x13c] sm:$0xf]  ;;  %v2934_v29 = vld [vmem:[%s5586_s0 + $0x15c] sm:$0xf0] }
  0x94   :  { %1245 = vmatmul.bf16.gmra.mxu3 %v3029_v31  ;;  %v2862_v31 = vld [vmem:[%s5586_s0 + $0xcc] sm:$0xf0] }
  0x95   :  { %v2865_v40 = vor.u32 %v4015_v30, %v2862_v31 }
  0x9e   :  { %v1064_v44 = vpop.f32.mrf.mxu0 }
  0x9f   :  { %v1065_v47 = vadd.f32 %v4719_v32, %v1064_v44 }
  0xa0   :  { %v1113_v48 = vpop.f32.mrf.mxu1 }
  0xa1   :  { %v1114_v49 = vadd.f32 %v1113_v48, %v1065_v47  ;;  %1259 = vmatmul.bf16.vlgmr.msrb.gmra.mxu0 %v2781_v42 }
  0xa2   :  { %1357 = vmatmul.bf16.vlgmr.msrb.gmra.mxu2 %v2789_v43 }
  0xa3   :  { %1308 = vmatmul.bf16.vlgmr.msrb.gmra.mxu1 %v2785_v45 }
  0xa4   :  { %1406 = vmatmul.bf16.vlgmr.msrb.gmra.mxu3 %v2793_v46 }
  0xa5   :  { %v1162_v50 = vpop.f32.mrf.mxu2 }
  0xa6   :  { %v1163_v51 = vadd.f32 %v1162_v50, %v1114_v49  ;;  %v1066_v53 = vpop.f32.mrf.mxu0 }
  0xa7   :  { %v1211_v52 = vpop.f32.mrf.mxu3  ;;  %v1067_v54 = vadd.f32 %v4719_v32, %v1066_v53  ;;  %v2888_v53 = vld [vmem:[%s5586_s0 + $0xe8] sm:$0xf] }
  0xa8   :  { %v4750_v55 = vadd.f32 %v1211_v52, %v1163_v51  ;;  %v1115_v56 = vpop.f32.mrf.mxu1 }
  0xa9   :  { %v1116_v57 = vadd.f32 %v1115_v56, %v1067_v54  ;;  %v4027_v54 = vld [vmem:[%s5586_s0 + $0x108] sm:$0xf0]  ;;  %v4134_v56 = vld [vmem:[%s5587_s1 + $0x220] sm:$0xff] }
  0xaa   :  { %1450 = vmatpush.bf16.msra.mxu0 %v4134_v56  ;;  %v2889_v2 = vor.u32 %v4027_v54, %v2888_v53  ;;  %v4132_v53 = vld [vmem:[%s5587_s1 + $0x210] sm:$0xff]  ;;  %v2968_v54 = vld [vmem:[%s5586_s0 + $0x180] sm:$0xf]  ;;  %v4046_v56 = vld [vmem:[%s5586_s0 + $0x1a0] sm:$0xf0] }
  0xad   :  { %v1164_v3 = vpop.f32.mrf.mxu2 }
  0xae   :  { %v1165_v4 = vadd.f32 %v1164_v3, %v1116_v57  ;;  %v1069_v8 = vpop.f32.mrf.mxu0  ;;  %v2896_v57 = vld [vmem:[%s5586_s0 + $0xf0] sm:$0xf]  ;;  %1451 = vmatpush.bf16.msra.mxu0 %v4133_v23  ;;  %v2998_v23 = vld [vmem:[%s5586_s0 + $0x1e4] sm:$0xf0] }
  0xaf   :  { %v1213_v5 = vpop.f32.mrf.mxu3  ;;  %v1070_v11 = vadd.f32 %v4719_v32, %v1069_v8  ;;  %v2897_v3 = vor.u32 %v4028_v58, %v2896_v57  ;;  %v4041_v57 = vld [vmem:[%s5586_s0 + $0x17c] sm:$0xf]  ;;  %v2962_v58 = vld [vmem:[%s5586_s0 + $0x19c] sm:$0xf0] }
  0xb0   :  { %v4780_v12 = vadd.f32 %v1213_v5, %v1165_v4  ;;  %v1118_v13 = vpop.f32.mrf.mxu1  ;;  %v2893_v5 = vor.u32 %v4023_v59, %v2890_v60  ;;  %v4042_v59 = vld [vmem:[%s5586_s0 + $0x184] sm:$0xf]  ;;  %v2970_v60 = vld [vmem:[%s5586_s0 + $0x1a4] sm:$0xf0] }
  0xb1   :  { %v1119_v14 = vadd.f32 %v1118_v13, %v1070_v11  ;;  %1264 = vmatmul.bf16.gmra.mxu0 %v2817_v6  ;;  %v2901_v6 = vor.u32 %v4024_v61, %v2898_v62 }
  0xb2   :  { %1362 = vmatmul.bf16.gmra.mxu2 %v2825_v7  ;;  %1452 = vmatpush.bf16.msra.mxu0 %v4132_v53  ;;  %v4064_v53 = vld [vmem:[%s5586_s0 + $0x230] sm:$0xf0] }
  0xb3   :  { %1313 = vmatmul.bf16.gmra.mxu1 %v2821_v9 }
  0xb4   :  { %1411 = vmatmul.bf16.gmra.mxu3 %v2829_v10 }
  0xb5   :  { %v1167_v15 = vpop.f32.mrf.mxu2 }
  0xb6   :  { %v1168_v16 = vadd.f32 %v1167_v15, %v1119_v14  ;;  %v1071_v18 = vpop.f32.mrf.mxu0 }
  0xb7   :  { %v1216_v17 = vpop.f32.mrf.mxu3  ;;  %v1072_v19 = vadd.f32 %v4719_v32, %v1071_v18 }
  0xb8   :  { %v4783_v20 = vadd.f32 %v1216_v17, %v1168_v16  ;;  %v1120_v21 = vpop.f32.mrf.mxu1 }
  0xb9   :  { %v1121_v22 = vadd.f32 %v1120_v21, %v1072_v19  ;;  %v2924_v21 = vld [vmem:[%s5586_s0 + $0x130] sm:$0xf] }
  0xbd   :  { %v1169_v33 = vpop.f32.mrf.mxu2 }
  0xbe   :  { %v1170_v34 = vadd.f32 %v1169_v33, %v1121_v22  ;;  %v1074_v38 = vpop.f32.mrf.mxu0  ;;  %v4036_v22 = vld [vmem:[%s5586_s0 + $0x150] sm:$0xf0] }
  0xbf   :  { %v1218_v35 = vpop.f32.mrf.mxu3  ;;  %v1075_v41 = vadd.f32 %v4719_v32, %v1074_v38  ;;  %v2937_v38 = vor.u32 %v4033_v28, %v2934_v29 }
  0xc0   :  { %v4813_v42 = vadd.f32 %v1218_v35, %v1170_v34  ;;  %v1123_v43 = vpop.f32.mrf.mxu1  ;;  %v2925_v34 = vor.u32 %v4036_v22, %v2924_v21  ;;  %v2933_v35 = vor.u32 %v4037_v25, %v2932_v24  ;;  %v4055_v21 = vld [vmem:[%s5586_s0 + $0x1e8] sm:$0xf0]  ;;  %v4050_v22 = vld [vmem:[%s5586_s0 + $0x1c4] sm:$0xf]  ;;  %v3006_v25 = vld [vmem:[%s5586_s0 + $0x1ec] sm:$0xf0] }
  0xc1   :  { %v1124_v44 = vadd.f32 %v1123_v43, %v1075_v41  ;;  %1269 = vmatmul.bf16.gmra.mxu0 %v2853_v36  ;;  %v4051_v24 = vld [vmem:[%s5586_s0 + $0x1cc] sm:$0xf] }
  0xc2   :  { %1367 = vmatmul.bf16.gmra.mxu2 %v2861_v37  ;;  %v2929_v37 = vor.u32 %v4032_v26, %v2926_v27  ;;  %v4130_v27 = vld [vmem:[%s5587_s1 + $0x200] sm:$0xff] }
  0xc3   :  { %1318 = vmatmul.bf16.gmra.mxu1 %v2857_v39 }
  0xc4   :  { %1416 = vmatmul.bf16.gmra.mxu3 %v2865_v40 }
  0xc5   :  { %v1172_v45 = vpop.f32.mrf.mxu2 }
  0xc6   :  { %v1173_v46 = vadd.f32 %v1172_v45, %v1124_v44  ;;  %v1076_v48 = vpop.f32.mrf.mxu0 }
  0xc7   :  { %v1221_v47 = vpop.f32.mrf.mxu3  ;;  %v1077_v49 = vadd.f32 %v4719_v32, %v1076_v48 }
  0xc8   :  { %v4816_v50 = vadd.f32 %v1221_v47, %v1173_v46  ;;  %v1125_v51 = vpop.f32.mrf.mxu1 }
  0xc9   :  { %v1126_v52 = vadd.f32 %v1125_v51, %v1077_v49  ;;  %v2960_v51 = vld [vmem:[%s5586_s0 + $0x178] sm:$0xf] }
  0xcd   :  { %v1174_v63 = vpop.f32.mrf.mxu2 }
  0xce   :  { %v1175_v0 = vadd.f32 %v1174_v63, %v1126_v52  ;;  %v1079_v4 = vpop.f32.mrf.mxu0  ;;  %v4045_v52 = vld [vmem:[%s5586_s0 + $0x198] sm:$0xf0] }
  0xcf   :  { %v1223_v1 = vpop.f32.mrf.mxu3  ;;  %v1080_v7 = vadd.f32 %v4719_v32, %v1079_v4  ;;  %v2961_v63 = vor.u32 %v4045_v52, %v2960_v51  ;;  %v4063_v51 = vld [vmem:[%s5586_s0 + $0x228] sm:$0xf0]  ;;  %v3040_v52 = vld [vmem:[%s5586_s0 + $0x210] sm:$0xf] }
  0xd0   :  { %v4846_v8 = vadd.f32 %v1223_v1, %v1175_v0  ;;  %v1128_v9 = vpop.f32.mrf.mxu1  ;;  %v2969_v0 = vor.u32 %v4046_v56, %v2968_v54  ;;  %v4059_v54 = vld [vmem:[%s5586_s0 + $0x20c] sm:$0xf]  ;;  %v3034_v56 = vld [vmem:[%s5586_s0 + $0x22c] sm:$0xf0] }
  0xd1   :  { %v1129_v10 = vadd.f32 %v1128_v9, %v1080_v7  ;;  %1274 = vmatmul.bf16.gmra.mxu0 %v2889_v2  ;;  %v2965_v2 = vor.u32 %v4041_v57, %v2962_v58  ;;  %v4060_v57 = vld [vmem:[%s5586_s0 + $0x214] sm:$0xf]  ;;  %v3042_v58 = vld [vmem:[%s5586_s0 + $0x234] sm:$0xf0] }
  0xd2   :  { %1372 = vmatmul.bf16.gmra.mxu2 %v2897_v3  ;;  %v2973_v3 = vor.u32 %v4042_v59, %v2970_v60 }
  0xd3   :  { %1323 = vmatmul.bf16.gmra.mxu1 %v2893_v5 }
  0xd4   :  { %1421 = vmatmul.bf16.gmra.mxu3 %v2901_v6 }
  0xd5   :  { %v1177_v11 = vpop.f32.mrf.mxu2 }
  0xd6   :  { %v1178_v13 = vadd.f32 %v1177_v11, %v1129_v10  ;;  %v1081_v15 = vpop.f32.mrf.mxu0 }
  0xd7   :  { %v1226_v14 = vpop.f32.mrf.mxu3  ;;  %v1082_v16 = vadd.f32 %v4719_v32, %v1081_v15  ;;  %v4131_v15 = vld [vmem:[%s5587_s1 + $0x208] sm:$0xff] }
  0xd8   :  { %v4849_v17 = vadd.f32 %v1226_v14, %v1178_v13  ;;  %v1130_v18 = vpop.f32.mrf.mxu1  ;;  %1453 = vmatpush.bf16.msra.mxu0 %v4131_v15 }
  0xd9   :  { %v1131_v19 = vadd.f32 %v1130_v18, %v1082_v16  ;;  %v2996_v16 = vld [vmem:[%s5586_s0 + $0x1c0] sm:$0xf]  ;;  %v4054_v18 = vld [vmem:[%s5586_s0 + $0x1e0] sm:$0xf0] }
  0xda   :  { %v2997_v29 = vor.u32 %v4054_v18, %v2996_v16 }
  0xdc   :  { %1454 = vmatpush.bf16.msra.mxu0 %v4130_v27 }
  0xdd   :  { %v1179_v30 = vpop.f32.mrf.mxu2 }
  0xde   :  { %v1180_v31 = vadd.f32 %v1179_v30, %v1131_v19  ;;  %v1084_v36 = vpop.f32.mrf.mxu0  ;;  %v3004_v19 = vld [vmem:[%s5586_s0 + $0x1c8] sm:$0xf] }
  0xdf   :  { %v1228_v33 = vpop.f32.mrf.mxu3  ;;  %v1085_v39 = vadd.f32 %v4719_v32, %v1084_v36  ;;  %v3005_v30 = vor.u32 %v4055_v21, %v3004_v19  ;;  %v2796_v19 = vld [vmem:[%s5586_s0 + $0x20] sm:$0xf]  ;;  %v4002_v21 = vld [vmem:[%s5586_s0 + $0x40] sm:$0xf0] }
  0xe0   :  { %v4879_v40 = vadd.f32 %v1228_v33, %v1180_v31  ;;  %v1133_v41 = vpop.f32.mrf.mxu1  ;;  %v3001_v33 = vor.u32 %v4050_v22, %v2998_v23 }
  0xe1   :  { %v1134_v43 = vadd.f32 %v1133_v41, %v1085_v39  ;;  %1279 = vmatmul.bf16.gmra.mxu0 %v2925_v34  ;;  %v3009_v34 = vor.u32 %v4051_v24, %v3006_v25  ;;  %v2797_v24 = vor.u32 %v4002_v21, %v2796_v19 }
  0xe2   :  { %1377 = vmatmul.bf16.gmra.mxu2 %v2933_v35 }
  0xe3   :  { %1328 = vmatmul.bf16.gmra.mxu1 %v2929_v37 }
  0xe4   :  { %1426 = vmatmul.bf16.gmra.mxu3 %v2937_v38 }
  0xe5   :  { %v1182_v44 = vpop.f32.mrf.mxu2 }
  0xe6   :  { %v1183_v45 = vadd.f32 %v1182_v44, %v1134_v43  ;;  %v4881_v47 = vpop.f32.mrf.mxu0 }
  0xe7   :  { %v1231_v46 = vpop.f32.mrf.mxu3 }
  0xe8   :  { %v4883_v48 = vadd.f32 %v1231_v46, %v1183_v45  ;;  %v4885_v49 = vpop.f32.mrf.mxu1  ;;  %v3032_v46 = vld [vmem:[%s5586_s0 + $0x208] sm:$0xf] }
  0xed   :  { %v4914_v61 = vpop.f32.mrf.mxu2 }
  0xee   :  { %v1089_v1 = vpop.f32.mrf.mxu0 }
  0xef   :  { %v4916_v62 = vpop.f32.mrf.mxu3  ;;  %v1090_v4 = vadd.f32 %v4719_v32, %v1089_v1 }
  0xf0   :  { %v1138_v5 = vpop.f32.mrf.mxu1 }
  0xf1   :  { %v1139_v6 = vadd.f32 %v1138_v5, %v1090_v4  ;;  %1284 = vmatmul.bf16.gmra.mxu0 %v2961_v63  ;;  %v3033_v63 = vor.u32 %v4063_v51, %v3032_v46 }
  0xf2   :  { %1382 = vmatmul.bf16.gmra.mxu2 %v2969_v0  ;;  %v3041_v0 = vor.u32 %v4064_v53, %v3040_v52 }
  0xf3   :  { %1333 = vmatmul.bf16.gmra.mxu1 %v2965_v2  ;;  %v3037_v2 = vor.u32 %v4059_v54, %v3034_v56 }
  0xf4   :  { %1431 = vmatmul.bf16.gmra.mxu3 %v2973_v3  ;;  %v3045_v3 = vor.u32 %v4060_v57, %v3042_v58 }
  0xf5   :  { %v1187_v7 = vpop.f32.mrf.mxu2 }
  0xf6   :  { %v1188_v9 = vadd.f32 %v1187_v7, %v1139_v6  ;;  %v4919_v11 = vpop.f32.mrf.mxu0 }
  0xf7   :  { %v1236_v10 = vpop.f32.mrf.mxu3 }
  0xf8   :  { %v4921_v13 = vadd.f32 %v1236_v10, %v1188_v9  ;;  %v4923_v14 = vpop.f32.mrf.mxu1 }
  0xfd   :  { %v4952_v26 = vpop.f32.mrf.mxu2 }
  0xfe   :  { %v1094_v31 = vpop.f32.mrf.mxu0 }
  0xff   :  { %v4957_v28 = vpop.f32.mrf.mxu3  ;;  %v1095_v35 = vadd.f32 %v4719_v32, %v1094_v31 }
 0x100   :  { %v1143_v36 = vpop.f32.mrf.mxu1 }
 0x101   :  { %v1144_v37 = vadd.f32 %v1143_v36, %v1095_v35  ;;  %1289 = vmatmul.bf16.gmra.mxu0 %v2997_v29 }
 0x102   :  { %1387 = vmatmul.bf16.gmra.mxu2 %v3005_v30 }
 0x103   :  { %1338 = vmatmul.bf16.gmra.mxu1 %v3001_v33 }
 0x104   :  { %1436 = vmatmul.bf16.gmra.mxu3 %v3009_v34 }
 0x105   :  { %v1192_v38 = vpop.f32.mrf.mxu2 }
 0x106   :  { %v1193_v39 = vadd.f32 %v1192_v38, %v1144_v37  ;;  %v4960_v43 = vpop.f32.mrf.mxu0 }
 0x107   :  { %v1241_v41 = vpop.f32.mrf.mxu3 }
 0x108   :  { %v4962_v44 = vadd.f32 %v1241_v41, %v1193_v39  ;;  %v4964_v45 = vpop.f32.mrf.mxu1  ;;  %v2832_v39 = vld [vmem:[%s5586_s0 + $0x68] sm:$0xf] }
 0x10d   :  { %v4990_v59 = vpop.f32.mrf.mxu2 }
 0x10e   :  { %v1099_v1 = vpop.f32.mrf.mxu0 }
 0x10f   :  { %v4992_v60 = vpop.f32.mrf.mxu3  ;;  %v1100_v4 = vadd.f32 %v4719_v32, %v1099_v1 }
 0x110   :  { %v1148_v5 = vpop.f32.mrf.mxu1 }
 0x111   :  { %v1149_v6 = vadd.f32 %v1148_v5, %v1100_v4  ;;  %1294 = vmatmul.bf16.gmra.mxu0 %v3033_v63 }
 0x112   :  { %1392 = vmatmul.bf16.gmra.mxu2 %v3041_v0 }
 0x113   :  { %1343 = vmatmul.bf16.gmra.mxu1 %v3037_v2 }
 0x114   :  { %1441 = vmatmul.bf16.gmra.mxu3 %v3045_v3 }
 0x115   :  { %v1197_v7 = vpop.f32.mrf.mxu2 }
 0x116   :  { %v1198_v9 = vadd.f32 %v1197_v7, %v1149_v6  ;;  %v4995_v15 = vpop.f32.mrf.mxu0  ;;  %v2868_v7 = vld [vmem:[%s5586_s0 + $0xb0] sm:$0xf] }
 0x117   :  { %v1246_v10 = vpop.f32.mrf.mxu3 }
 0x118   :  { %v4997_v16 = vadd.f32 %v1246_v10, %v1198_v9  ;;  %v4999_v18 = vpop.f32.mrf.mxu1 }
 0x11d   :  { %v5007_v22 = vpop.f32.mrf.mxu2 }
 0x11e   :  { %v1260_v25 = vpop.f32.mrf.mxu0 }
 0x11f   :  { %v5009_v23 = vpop.f32.mrf.mxu3  ;;  %v1261_v27 = vadd.f32 %v1260_v25, %v4750_v55  ;;  %v4011_v55 = vld [vmem:[%s5586_s0 + $0x88] sm:$0xf0] }
 0x120   :  { %v1309_v29 = vpop.f32.mrf.mxu1  ;;  %v2833_v53 = vor.u32 %v4011_v55, %v2832_v39  ;;  %v2904_v55 = vld [vmem:[%s5586_s0 + $0xf8] sm:$0xf] }
 0x121   :  { %v1310_v30 = vadd.f32 %v1309_v29, %v1261_v27  ;;  %1455 = vmatmul.bf16.vlgmr.msra.gmra.mxu0 %v2797_v24 }
 0x125   :  { %v1358_v31 = vpop.f32.mrf.mxu2 }
 0x126   :  { %v1359_v33 = vadd.f32 %v1358_v31, %v1310_v30  ;;  %v1262_v35 = vpop.f32.mrf.mxu0 }
 0x127   :  { %v1407_v34 = vpop.f32.mrf.mxu3  ;;  %v1263_v36 = vadd.f32 %v1262_v35, %v4780_v12 }
 0x128   :  { %v5013_v37 = vadd.f32 %v1407_v34, %v1359_v33  ;;  %v1311_v38 = vpop.f32.mrf.mxu1 }
 0x129   :  { %v1312_v41 = vadd.f32 %v1311_v38, %v1263_v36 }
 0x12d   :  { %v1360_v46 = vpop.f32.mrf.mxu2 }
 0x12e   :  { %v1361_v51 = vadd.f32 %v1360_v46, %v1312_v41  ;;  %v1265_v54 = vpop.f32.mrf.mxu0 }
 0x12f   :  { %v1409_v52 = vpop.f32.mrf.mxu3  ;;  %v1266_v56 = vadd.f32 %v1265_v54, %v4783_v20  ;;  %v4020_v20 = vld [vmem:[%s5586_s0 + $0xd0] sm:$0xf0] }
 0x130   :  { %v5022_v12 = vadd.f32 %v1409_v52, %v1361_v51  ;;  %v1314_v57 = vpop.f32.mrf.mxu1  ;;  %v2869_v21 = vor.u32 %v4020_v20, %v2868_v7  ;;  %v2940_v7 = vld [vmem:[%s5586_s0 + $0x140] sm:$0xf] }
 0x131   :  { %v1315_v58 = vadd.f32 %v1314_v57, %v1266_v56  ;;  %1460 = vmatmul.bf16.gmra.mxu0 %v2833_v53 }
 0x135   :  { %v1363_v63 = vpop.f32.mrf.mxu2 }
 0x136   :  { %v1364_v0 = vadd.f32 %v1363_v63, %v1315_v58  ;;  %v1267_v2 = vpop.f32.mrf.mxu0 }
 0x137   :  { %v1412_v1 = vpop.f32.mrf.mxu3  ;;  %v1268_v3 = vadd.f32 %v1267_v2, %v4813_v42 }
 0x138   :  { %v5025_v4 = vadd.f32 %v1412_v1, %v1364_v0  ;;  %v1316_v5 = vpop.f32.mrf.mxu1 }
 0x139   :  { %v1317_v6 = vadd.f32 %v1316_v5, %v1268_v3 }
 0x13d   :  { %v1365_v9 = vpop.f32.mrf.mxu2 }
 0x13e   :  { %v1366_v10 = vadd.f32 %v1365_v9, %v1317_v6  ;;  %v1270_v24 = vpop.f32.mrf.mxu0 }
 0x13f   :  { %v1414_v19 = vpop.f32.mrf.mxu3  ;;  %v1271_v25 = vadd.f32 %v1270_v24, %v4816_v50  ;;  %v4029_v50 = vld [vmem:[%s5586_s0 + $0x118] sm:$0xf0] }
 0x140   :  { %v5034_v42 = vadd.f32 %v1414_v19, %v1366_v10  ;;  %v1319_v27 = vpop.f32.mrf.mxu1  ;;  %v2905_v52 = vor.u32 %v4029_v50, %v2904_v55  ;;  %v3012_v50 = vld [vmem:[%s5586_s0 + $0x1d0] sm:$0xf] }
 0x141   :  { %v1320_v29 = vadd.f32 %v1319_v27, %v1271_v25  ;;  %1465 = vmatmul.bf16.gmra.mxu0 %v2869_v21  ;;  %v2976_v27 = vld [vmem:[%s5586_s0 + $0x188] sm:$0xf] }
 0x145   :  { %v1368_v30 = vpop.f32.mrf.mxu2 }
 0x146   :  { %v1369_v31 = vadd.f32 %v1368_v30, %v1320_v29  ;;  %v1272_v34 = vpop.f32.mrf.mxu0  ;;  %v4047_v29 = vld [vmem:[%s5586_s0 + $0x1a8] sm:$0xf0]  ;;  %v1092_v30 = vadd.f32 %v4719_v32, %v4919_v11  ;;  %v4056_v11 = vld [vmem:[%s5586_s0 + $0x1f0] sm:$0xf0] }
 0x147   :  { %v1417_v33 = vpop.f32.mrf.mxu3  ;;  %v1273_v35 = vadd.f32 %v1272_v34, %v4846_v8 }
 0x148   :  { %v5037_v36 = vadd.f32 %v1417_v33, %v1369_v31  ;;  %v1321_v38 = vpop.f32.mrf.mxu1  ;;  %v2977_v31 = vor.u32 %v4047_v29, %v2976_v27  ;;  %v4159_v29 = vld [vmem:[%s5589_s3 + $0xa8] sm:$0xff] }
 0x149   :  { %v1322_v39 = vadd.f32 %v1321_v38, %v1273_v35 }
 0x14d   :  { %v1370_v41 = vpop.f32.mrf.mxu2 }
 0x14e   :  { %v1371_v46 = vadd.f32 %v1370_v41, %v1322_v39  ;;  %v1275_v53 = vpop.f32.mrf.mxu0 }
 0x14f   :  { %v1419_v51 = vpop.f32.mrf.mxu3  ;;  %v1276_v54 = vadd.f32 %v1275_v53, %v4849_v17  ;;  %v4038_v17 = vld [vmem:[%s5586_s0 + $0x160] sm:$0xf0] }
 0x150   :  { %v5046_v8 = vadd.f32 %v1419_v51, %v1371_v46  ;;  %v1324_v56 = vpop.f32.mrf.mxu1  ;;  %v2941_v19 = vor.u32 %v4038_v17, %v2940_v7  ;;  %v4160_v17 = vld [vmem:[%s5589_s3 + $0xb0] sm:$0xff] }
 0x151   :  { %v1325_v57 = vadd.f32 %v1324_v56, %v1276_v54  ;;  %1470 = vmatmul.bf16.gmra.mxu0 %v2905_v52  ;;  %v3048_v54 = vld [vmem:[%s5586_s0 + $0x218] sm:$0xf] }
 0x155   :  { %v1373_v58 = vpop.f32.mrf.mxu2 }
 0x156   :  { %v1374_v63 = vadd.f32 %v1373_v58, %v1325_v57  ;;  %v1277_v1 = vpop.f32.mrf.mxu0 }
 0x157   :  { %v1422_v0 = vpop.f32.mrf.mxu3  ;;  %v1278_v2 = vadd.f32 %v1277_v1, %v4879_v40  ;;  %v4153_v1 = vld [vmem:[%s5589_s3 + $0x78] sm:$0xff] }
 0x158   :  { %v5049_v3 = vadd.f32 %v1422_v0, %v1374_v63  ;;  %v1326_v5 = vpop.f32.mrf.mxu1  ;;  %1620 = vmatpush.bf16.msra.mxu1 %v4153_v1 }
 0x159   :  { %v1327_v6 = vadd.f32 %v1326_v5, %v1278_v2  ;;  %v4152_v5 = vld [vmem:[%s5589_s3 + $0x70] sm:$0xff] }
 0x15c   :  { %1621 = vmatpush.bf16.msra.mxu1 %v4152_v5 }
 0x15d   :  { %v1375_v20 = vpop.f32.mrf.mxu2 }
 0x15e   :  { %v1376_v9 = vadd.f32 %v1375_v20, %v1327_v6  ;;  %v1280_v21 = vpop.f32.mrf.mxu0  ;;  %v4144_v6 = vld [vmem:[%s5589_s3 + $0x30] sm:$0xff] }
 0x15f   :  { %v1424_v10 = vpop.f32.mrf.mxu3  ;;  %v5058_v24 = vadd.f32 %v1280_v21, %v4883_v48  ;;  %v1141_v48 = vadd.f32 %v4923_v14, %v1092_v30  ;;  %v3013_v14 = vor.u32 %v4056_v11, %v3012_v50 }
 0x160   :  { %v5060_v40 = vadd.f32 %v1424_v10, %v1376_v9  ;;  %v4151_v9 = vld [vmem:[%s5589_s3 + $0x68] sm:$0xff]  ;;  %v5146_v30 = vpop.f32.mrf.mxu1 }
 0x161   :  { %1475 = vmatmul.bf16.gmra.mxu0 %v2941_v19  ;;  %v1190_v35 = vadd.f32 %v4952_v26, %v1141_v48  ;;  %v4143_v10 = vld [vmem:[%s5589_s3 + $0x28] sm:$0xff]  ;;  %1622 = vmatpush.bf16.msra.mxu1 %v4151_v9  ;;  %v4169_v9 = vld [vmem:[%s5589_s3 + $0xf8] sm:$0xff] }
 0x163   :  { %v1239_v38 = vadd.f32 %v4957_v28, %v1190_v35 }
 0x165   :  { %v5149_v48 = vpop.f32.mrf.mxu2 }
 0x166   :  { %v5062_v25 = vpop.f32.mrf.mxu0 }
 0x167   :  { %v5159_v11 = vpop.f32.mrf.mxu3 }
 0x16e   :  { %v1285_v33 = vpop.f32.mrf.mxu0 }
 0x16f   :  { %v5074_v34 = vadd.f32 %v1285_v33, %v4921_v13  ;;  %v1097_v13 = vadd.f32 %v4719_v32, %v4960_v43  ;;  %v4065_v43 = vld [vmem:[%s5586_s0 + $0x238] sm:$0xf0]  ;;  %s2753_s0 = sshll.u32 %s5593_s7, 4  ;;  %s2754_s0 = int_to_ptr.hbm [resolvable:$true] %s2753_s0 }
 0x171   :  { %1480 = vmatmul.bf16.gmra.mxu0 %v2977_v31  ;;  %v1146_v26 = vadd.f32 %v4964_v45, %v1097_v13  ;;  %v3049_v45 = vor.u32 %v4065_v43, %v3048_v54  ;;  %v4149_v54 = vld [vmem:[%s5589_s3 + $0x58] sm:$0xff]  ;;  %v5179_v43 = vpop.f32.mrf.mxu2 }
 0x173   :  { %v1195_v46 = vadd.f32 %v4990_v59, %v1146_v26  ;;  %v5168_v26 = vpop.f32.mrf.mxu1 }
 0x175   :  { %v1244_v51 = vadd.f32 %v4992_v60, %v1195_v46 }
 0x176   :  { %v1287_v39 = vpop.f32.mrf.mxu0 }
 0x177   :  { %v5078_v55 = vadd.f32 %v1287_v39, %v1239_v38  ;;  %v4142_v39 = vld [vmem:[%s5589_s3 + $0x20] sm:$0xff] }
 0x17e   :  { %v1290_v41 = vpop.f32.mrf.mxu0 }
 0x17f   :  { %v5090_v28 = vadd.f32 %v1290_v41, %v4962_v44  ;;  %v1102_v44 = vadd.f32 %v4719_v32, %v4995_v15  ;;  %v4145_v15 = vld [vmem:[%s5589_s3 + $0x38] sm:$0xff]  ;;  %v4158_v41 = vld [vmem:[%s5589_s3 + $0xa0] sm:$0xff] }
 0x180   :  { %1681 = vmatpush.bf16.msra.mxu2 %v4145_v15 }
 0x181   :  { %1485 = vmatmul.bf16.gmra.mxu0 %v3013_v14  ;;  %v1151_v59 = vadd.f32 %v4999_v18, %v1102_v44 }
 0x183   :  { %v1200_v57 = vadd.f32 %v5007_v22, %v1151_v59  ;;  %v4161_v22 = vld [vmem:[%s5589_s3 + $0xb8] sm:$0xff] }
 0x184   :  { %1765 = vmatpush.bf16.msra.mxu3 %v4161_v22  ;;  %1682 = vmatpush.bf16.msra.mxu2 %v4144_v6  ;;  %v5204_v22 = vpop.f32.mrf.mxu1  ;;  %v5214_v6 = vpop.f32.mrf.mxu2 }
 0x185   :  { %v1249_v58 = vadd.f32 %v5009_v23, %v1200_v57 }
 0x186   :  { %v1292_v52 = vpop.f32.mrf.mxu0 }
 0x187   :  { %v5094_v53 = vadd.f32 %v1292_v52, %v1244_v51  ;;  %v4140_v52 = vld [vmem:[%s5589_s3 + $0x10] sm:$0xff] }
 0x188   :  { %1766 = vmatpush.bf16.msra.mxu3 %v4160_v17  ;;  %1683 = vmatpush.bf16.msra.mxu2 %v4143_v10  ;;  %v4146_v17 = vld [vmem:[%s5589_s3 + $0x40] sm:$0xff]  ;;  %v4185_v10 = vld [vmem:[%s5589_s3 + $0x178] sm:$0xff] }
 0x18c   :  { %1767 = vmatpush.bf16.msra.mxu3 %v4159_v29  ;;  %1684 = vmatpush.bf16.msra.mxu2 %v4142_v39  ;;  %v5246_v29 = vpop.f32.mrf.mxu2  ;;  %v4173_v39 = vld [vmem:[%s5589_s3 + $0x118] sm:$0xff] }
 0x18e   :  { %v1295_v56 = vpop.f32.mrf.mxu0 }
 0x18f   :  { %v5106_v60 = vadd.f32 %v1295_v56, %v4997_v16  ;;  %v5186_v56 = vpop.f32.mrf.mxu3 }
 0x190   :  { %1768 = vmatpush.bf16.msra.mxu3 %v4158_v41  ;;  %v1087_v41 = vadd.f32 %v4719_v32, %v4881_v47  ;;  %v4181_v32 = vld [vmem:[%s5589_s3 + $0x158] sm:$0xff]  ;;  %v4239_v47 = vld [vmem:[%s5589_s3 + $0x328] sm:$0xff] }
 0x191   :  { %1490 = vmatmul.bf16.gmra.mxu0 %v3049_v45  ;;  %v4139_v45 = vld [vmem:[%s5589_s3 + $0x8] sm:$0xff] }
 0x196   :  { %v1297_v63 = vpop.f32.mrf.mxu0 }
 0x197   :  { %v5110_v0 = vadd.f32 %v1297_v63, %v1249_v58  ;;  %v4148_v58 = vld [vmem:[%s5589_s3 + $0x50] sm:$0xff] }
 0x198   :  { %v4156_v63 = vld [vmem:[%s5589_s3 + $0x90] sm:$0xff] }
 0x19e   :  { %v1456_v16 = vpop.f32.mrf.mxu0 }
 0x19f   :  { %v1457_v18 = vadd.f32 %v1456_v16, %v5013_v37  ;;  %v4241_v16 = vld [vmem:[%s5589_s3 + $0x338] sm:$0xff] }
 0x1a0   :  { %2600 = vmatpush.bf16.msrb.mxu0 %v4241_v16 }
 0x1a1   :  { %v1496_v21 = vmax.f32 %v1457_v18, 0.0  ;;  %v4177_v18 = vld [vmem:[%s5589_s3 + $0x138] sm:$0xff] }
 0x1a6   :  { %v1458_v23 = vpop.f32.mrf.mxu0 }
 0x1a7   :  { %v1459_v2 = vadd.f32 %v1458_v23, %v5022_v12  ;;  %v4147_v23 = vld [vmem:[%s5589_s3 + $0x48] sm:$0xff] }
 0x1a9   :  { %v1497_v35 = vmax.f32 %v1459_v2, 0.0  ;;  %v4155_v2 = vld [vmem:[%s5589_s3 + $0x88] sm:$0xff] }
 0x1ae   :  { %v1461_v7 = vpop.f32.mrf.mxu0 }
 0x1af   :  { %v1462_v37 = vadd.f32 %v1461_v7, %v5025_v4 }
 0x1b1   :  { %v1498_v46 = vmax.f32 %v1462_v37, 0.0  ;;  %v4176_v37 = vld [vmem:[%s5589_s3 + $0x130] sm:$0xff] }
 0x1b6   :  { %v1463_v20 = vpop.f32.mrf.mxu0 }
 0x1b7   :  { %v1464_v12 = vadd.f32 %v1463_v20, %v5034_v42  ;;  %v4154_v20 = vld [vmem:[%s5589_s3 + $0x80] sm:$0xff] }
 0x1b9   :  { %v1499_v1 = vmax.f32 %v1464_v12, 0.0  ;;  %v5227_v12 = vpop.f32.mrf.mxu3 }
 0x1be   :  { %v1466_v19 = vpop.f32.mrf.mxu0 }
 0x1bf   :  { %v1467_v4 = vadd.f32 %v1466_v19, %v5037_v36  ;;  %v4150_v36 = vld [vmem:[%s5589_s3 + $0x60] sm:$0xff]  ;;  %v4175_v19 = vld [vmem:[%s5589_s3 + $0x128] sm:$0xff] }
 0x1c0   :  { %1623 = vmatpush.bf16.msra.mxu1 %v4150_v36 }
 0x1c1   :  { %v1500_v27 = vmax.f32 %v1467_v4, 0.0  ;;  %v5238_v4 = vpop.f32.mrf.mxu1  ;;  %v5259_v36 = vpop.f32.mrf.mxu3 }
 0x1c3   :  { %v5144_v42 = vmax.f32 %v1496_v21, %v1500_v27  ;;  %v4168_v21 = vld [vmem:[%s5589_s3 + $0xf0] sm:$0xff] }
 0x1c4   :  { %1624 = vmatpush.bf16.msra.mxu1 %v4149_v54  ;;  %v4184_v27 = vld [vmem:[%s5589_s3 + $0x170] sm:$0xff]  ;;  %v1388_v54 = vpop.f32.mrf.mxu2 }
 0x1c6   :  { %v1468_v31 = vpop.f32.mrf.mxu0 }
 0x1c7   :  { %v1469_v33 = vadd.f32 %v1468_v31, %v5046_v8  ;;  %v4141_v8 = vld [vmem:[%s5589_s3 + $0x18] sm:$0xff] }
 0x1c8   :  { %1685 = vmatpush.bf16.msra.mxu2 %v4141_v8  ;;  %1625 = vmatpush.bf16.msra.mxu1 %v4148_v58  ;;  %v4240_v8 = vld [vmem:[%s5589_s3 + $0x330] sm:$0xff] }
 0x1c9   :  { %v1501_v38 = vmax.f32 %v1469_v33, 0.0  ;;  %v4174_v33 = vld [vmem:[%s5589_s3 + $0x120] sm:$0xff]  ;;  %2601 = vmatpush.bf16.msrb.mxu0 %v4240_v8  ;;  %v1437_v58 = vpop.f32.mrf.mxu3  ;;  %v4235_v8 = vld [vmem:[%s5589_s3 + $0x308] sm:$0xff] }
 0x1cb   :  { %v5157_v50 = vmax.f32 %v1497_v35, %v1501_v38  ;;  %v4167_v35 = vld [vmem:[%s5589_s3 + $0xe8] sm:$0xff] }
 0x1cc   :  { %1686 = vmatpush.bf16.msra.mxu2 %v4140_v52  ;;  %1626 = vmatpush.bf16.msra.mxu1 %v4147_v23  ;;  %v4183_v38 = vld [vmem:[%s5589_s3 + $0x168] sm:$0xff]  ;;  %v4172_v52 = vld [vmem:[%s5589_s3 + $0x110] sm:$0xff] }
 0x1cd   :  { %2602 = vmatpush.bf16.msrb.mxu0 %v4239_v47 }
 0x1ce   :  { %v1471_v13 = vpop.f32.mrf.mxu0 }
 0x1cf   :  { %v1472_v14 = vadd.f32 %v1471_v13, %v5049_v3  ;;  %v4157_v3 = vld [vmem:[%s5589_s3 + $0x98] sm:$0xff]  ;;  %v4166_v13 = vld [vmem:[%s5589_s3 + $0xe0] sm:$0xff] }
 0x1d0   :  { %1769 = vmatpush.bf16.msra.mxu3 %v4157_v3  ;;  %1687 = vmatpush.bf16.msra.mxu2 %v4139_v45  ;;  %v4165_v3 = vld [vmem:[%s5589_s3 + $0xd8] sm:$0xff]  ;;  %v1136_v45 = vadd.f32 %v4885_v49, %v1087_v41  ;;  %v4238_v49 = vld [vmem:[%s5589_s3 + $0x320] sm:$0xff] }
 0x1d1   :  { %v1502_v51 = vmax.f32 %v1472_v14, 0.0  ;;  %1627 = vmatpush.bf16.msra.mxu1 %v4146_v17  ;;  %v4182_v14 = vld [vmem:[%s5589_s3 + $0x160] sm:$0xff]  ;;  %2603 = vmatpush.bf16.msrb.mxu0 %v4238_v49  ;;  %v4179_v17 = vld [vmem:[%s5589_s3 + $0x148] sm:$0xff] }
 0x1d3   :  { %v5181_v44 = vmax.f32 %v1498_v46, %v1502_v51  ;;  %v1339_v46 = vpop.f32.mrf.mxu1 }
 0x1d4   :  { %1770 = vmatpush.bf16.msra.mxu3 %v4156_v63  ;;  %v4164_v63 = vld [vmem:[%s5589_s3 + $0xd0] sm:$0xff]  ;;  %v1340_v23 = vadd.f32 %v1339_v46, %v5090_v28 }
 0x1d5   :  { %1850 = vmatpush.bf16.msrb.mxu1 %v4169_v9 }
 0x1d6   :  { %v1473_v59 = vpop.f32.mrf.mxu0 }
 0x1d7   :  { %v1474_v57 = vadd.f32 %v1473_v59, %v5060_v40  ;;  %v4138_v40 = vld [vmem:[%s5589_s3] sm:$0xff]  ;;  %v4171_v59 = vld [vmem:[%s5589_s3 + $0x108] sm:$0xff] }
 0x1d8   :  { %1688 = vmatpush.bf16.msra.mxu2 %v4138_v40  ;;  %1771 = vmatpush.bf16.msra.mxu3 %v4155_v2 }
 0x1d9   :  { %v1503_v15 = vmax.f32 %v1474_v57, 0.0  ;;  %1851 = vmatpush.bf16.msrb.mxu1 %v4168_v21  ;;  %v1185_v57 = vadd.f32 %v4914_v61, %v1136_v45  ;;  %v4170_v61 = vld [vmem:[%s5589_s3 + $0x100] sm:$0xff]  ;;  %v1439_v21 = vpop.f32.mrf.mxu3 }
 0x1db   :  { %v5212_v5 = vmax.f32 %v1499_v1, %v1503_v15  ;;  %v4180_v1 = vld [vmem:[%s5589_s3 + $0x150] sm:$0xff]  ;;  %v1330_v15 = vadd.f32 %v5146_v30, %v5058_v24  ;;  %v1234_v40 = vadd.f32 %v4916_v62, %v1185_v57  ;;  %v1341_v2 = vpop.f32.mrf.mxu1  ;;  %v1389_v24 = vadd.f32 %v1388_v54, %v1340_v23  ;;  %v4163_v30 = vld [vmem:[%s5589_s3 + $0xc8] sm:$0xff]  ;;  %v4237_v62 = vld [vmem:[%s5589_s3 + $0x318] sm:$0xff] }
 0x1dc   :  { %1930 = vmatpush.bf16.msrb.mxu2 %v4177_v18  ;;  %1772 = vmatpush.bf16.msra.mxu3 %v4154_v20 }
 0x1dd   :  { %1852 = vmatpush.bf16.msrb.mxu1 %v4167_v35  ;;  %v1379_v18 = vadd.f32 %v5149_v48, %v1330_v15  ;;  %v1390_v48 = vpop.f32.mrf.mxu2  ;;  %2604 = vmatpush.bf16.msrb.mxu0 %v4237_v62  ;;  %v1438_v20 = vadd.f32 %v1437_v58, %v1389_v24 }
 0x1de   :  { %v5216_v7 = vpop.f32.mrf.mxu0 }
 0x1df   :  { %v1428_v28 = vadd.f32 %v5159_v11, %v1379_v18  ;;  %v4236_v11 = vld [vmem:[%s5589_s3 + $0x310] sm:$0xff] }
 0x1e0   :  { %1931 = vmatpush.bf16.msrb.mxu2 %v4176_v37  ;;  %2015 = vmatpush.bf16.msrb.mxu3 %v4185_v10  ;;  %v1283_v37 = vadd.f32 %v5062_v25, %v1234_v40  ;;  %v4162_v10 = vld [vmem:[%s5589_s3 + $0xc0] sm:$0xff] }
 0x1e1   :  { %1853 = vmatpush.bf16.msrb.mxu1 %v4166_v13  ;;  %v1477_v9 = vadd.f32 %v5216_v7, %v1428_v28  ;;  %2605 = vmatpush.bf16.msrb.mxu0 %v4236_v11  ;;  %v4193_v11 = vld [vmem:[%s5589_s3 + $0x1b8] sm:$0xff] }
 0x1e2   :  { %v1332_v25 = vadd.f32 %v5168_v26, %v1283_v37  ;;  %v1342_v26 = vadd.f32 %v1341_v2, %v5094_v53  ;;  %v1335_v53 = vadd.f32 %v5204_v22, %v5074_v34 }
 0x1e3   :  { %v1344_v13 = vpop.f32.mrf.mxu1 }
 0x1e4   :  { %1932 = vmatpush.bf16.msrb.mxu2 %v4175_v19  ;;  %2016 = vmatpush.bf16.msrb.mxu3 %v4184_v27  ;;  %v4178_v19 = vld [vmem:[%s5589_s3 + $0x140] sm:$0xff]  ;;  %v1391_v7 = vadd.f32 %v1390_v48, %v1342_v26  ;;  %v1384_v47 = vadd.f32 %v5214_v6, %v1335_v53 }
 0x1e5   :  { %1854 = vmatpush.bf16.msrb.mxu1 %v4165_v3  ;;  %v1393_v46 = vpop.f32.mrf.mxu2  ;;  %2606 = vmatpush.bf16.msrb.mxu0 %v4235_v8  ;;  %v4234_v3 = vld [vmem:[%s5589_s3 + $0x300] sm:$0xff] }
 0x1e6   :  { %v5248_v31 = vpop.f32.mrf.mxu0  ;;  %v1433_v22 = vadd.f32 %v5227_v12, %v1384_v47 }
 0x1e8   :  { %1933 = vmatpush.bf16.msrb.mxu2 %v4174_v33  ;;  %2017 = vmatpush.bf16.msrb.mxu3 %v4183_v38  ;;  %v1381_v33 = vadd.f32 %v5179_v43, %v1332_v25  ;;  %v1504_v38 = vmax.f32 %v1477_v9, 0.0  ;;  %v1440_v43 = vadd.f32 %v1439_v21, %v1391_v7  ;;  %v4209_v21 = vld [vmem:[%s5589_s3 + $0x238] sm:$0xff] }
 0x1e9   :  { %1855 = vmatpush.bf16.msrb.mxu1 %v4164_v63  ;;  %2607 = vmatpush.bf16.msrb.mxu0 %v4234_v3 }
 0x1eb   :  { %v1346_v63 = vpop.f32.mrf.mxu1 }
 0x1ec   :  { %1934 = vmatpush.bf16.msrb.mxu2 %v4173_v39  ;;  %2018 = vmatpush.bf16.msrb.mxu3 %v4182_v14  ;;  %v1430_v14 = vadd.f32 %v5186_v56, %v1381_v33  ;;  %v1345_v56 = vadd.f32 %v1344_v13, %v5106_v60  ;;  %v1347_v40 = vadd.f32 %v1346_v63, %v5110_v0  ;;  %v4201_v0 = vld [vmem:[%s5589_s3 + $0x1f8] sm:$0xff] }
 0x1ed   :  { %1856 = vmatpush.bf16.msrb.mxu1 %v4163_v30  ;;  %v1395_v15 = vpop.f32.mrf.mxu2 }
 0x1ee   :  { %v5275_v51 = vpop.f32.mrf.mxu0  ;;  %v1394_v57 = vadd.f32 %v1393_v46, %v1345_v56  ;;  %v1396_v2 = vadd.f32 %v1395_v15, %v1347_v40  ;;  %v4225_v15 = vld [vmem:[%s5589_s3 + $0x2b8] sm:$0xff]  ;;  %v4203_v40 = vld [vmem:[%s5589_s3 + $0x208] sm:$0xff] }
 0x1ef   :  { %v1482_v49 = vadd.f32 %v5275_v51, %v1433_v22 }
 0x1f0   :  { %1935 = vmatpush.bf16.msrb.mxu2 %v4172_v52  ;;  %2019 = vmatpush.bf16.msrb.mxu3 %v4181_v32  ;;  %v1479_v52 = vadd.f32 %v5248_v31, %v1430_v14  ;;  %v4191_v14 = vld [vmem:[%s5589_s3 + $0x1a8] sm:$0xff] }
 0x1f1   :  { %1857 = vmatpush.bf16.msrb.mxu1 %v4162_v10  ;;  %v1506_v12 = vmax.f32 %v1482_v49, 0.0  ;;  %v4194_v49 = vld [vmem:[%s5589_s3 + $0x1c0] sm:$0xff] }
 0x1f2   :  { %v1505_v58 = vmax.f32 %v1479_v52, 0.0  ;;  %v4190_v52 = vld [vmem:[%s5589_s3 + $0x1a0] sm:$0xff] }
 0x1f4   :  { %1936 = vmatpush.bf16.msrb.mxu2 %v4171_v59  ;;  %2020 = vmatpush.bf16.msrb.mxu3 %v4180_v1  ;;  %v1442_v59 = vpop.f32.mrf.mxu3 }
 0x1f5   :  { %v1443_v1 = vadd.f32 %v1442_v59, %v1394_v57  ;;  %v4189_v59 = vld [vmem:[%s5589_s3 + $0x198] sm:$0xff] }
 0x1f6   :  { %v5305_v16 = vpop.f32.mrf.mxu0  ;;  %v4205_v57 = vld [vmem:[%s5589_s3 + $0x218] sm:$0xff] }
 0x1f8   :  { %1937 = vmatpush.bf16.msrb.mxu2 %v4170_v61  ;;  %2021 = vmatpush.bf16.msrb.mxu3 %v4179_v17 }
 0x1fc   :  { %2022 = vmatpush.bf16.msrb.mxu3 %v4178_v19  ;;  %v1444_v24 = vpop.f32.mrf.mxu3 }
 0x1fd   :  { %v1445_v30 = vadd.f32 %v1444_v24, %v1396_v2  ;;  %v4224_v2 = vld [vmem:[%s5589_s3 + $0x2b0] sm:$0xff]  ;;  %v4217_v24 = vld [vmem:[%s5589_s3 + $0x278] sm:$0xff] }
 0x1fe   :  { %v1486_v27 = vpop.f32.mrf.mxu0 }
 0x1ff   :  { %v1487_v35 = vadd.f32 %v1486_v27, %v1438_v20 }
 0x201   :  { %v1508_v39 = vmax.f32 %v1487_v35, 0.0  ;;  %v4199_v35 = vld [vmem:[%s5589_s3 + $0x1e8] sm:$0xff] }
 0x203   :  { %v1516_v41 = vmax.f32 %v1504_v38, %v1508_v39  ;;  %v4192_v38 = vld [vmem:[%s5589_s3 + $0x1b0] sm:$0xff]  ;;  %v4198_v39 = vld [vmem:[%s5589_s3 + $0x1e0] sm:$0xff] }
 0x205   :  { %v1520_v54 = vmax.f32 %v5144_v42, %v1516_v41  ;;  %v1337_v42 = vadd.f32 %v5238_v4, %v5078_v55  ;;  %v4207_v41 = vld [vmem:[%s5589_s3 + $0x228] sm:$0xff] }
 0x206   :  { %v1488_v32 = vpop.f32.mrf.mxu0 }
 0x207   :  { %v1489_v45 = vadd.f32 %v1488_v32, %v1440_v43  ;;  %v1386_v61 = vadd.f32 %v5246_v29, %v1337_v42  ;;  %v4197_v43 = vld [vmem:[%s5589_s3 + $0x1d8] sm:$0xff]  ;;  %v4206_v32 = vld [vmem:[%s5589_s3 + $0x220] sm:$0xff]  ;;  %v4188_v42 = vld [vmem:[%s5589_s3 + $0x190] sm:$0xff] }
 0x209   :  { %v1509_v34 = vmax.f32 %v1489_v45, 0.0  ;;  %v1435_v55 = vadd.f32 %v5259_v36, %v1386_v61  ;;  %v4196_v45 = vld [vmem:[%s5589_s3 + $0x1d0] sm:$0xff]  ;;  %v4187_v61 = vld [vmem:[%s5589_s3 + $0x188] sm:$0xff] }
 0x20b   :  { %v1517_v31 = vmax.f32 %v1505_v58, %v1509_v34  ;;  %v1484_v51 = vadd.f32 %v5305_v16, %v1435_v55  ;;  %v4200_v16 = vld [vmem:[%s5589_s3 + $0x1f0] sm:$0xff]  ;;  %v4233_v55 = vld [vmem:[%s5589_s3 + $0x2f8] sm:$0xff] }
 0x20d   :  { %v1521_v6 = vmax.f32 %v5157_v50, %v1517_v31  ;;  %v1507_v25 = vmax.f32 %v1484_v51, 0.0  ;;  %v4195_v31 = vld [vmem:[%s5589_s3 + $0x1c8] sm:$0xff] }
 0x20e   :  { %v1491_v60 = vpop.f32.mrf.mxu0 }
 0x20f   :  { %v4253_v18 = vpack.c.bf16 %v1521_v6, %v1520_v54  ;;  %v1492_v23 = vadd.f32 %v1491_v60, %v1443_v1  ;;  %v4204_v1 = vld [vmem:[%s5589_s3 + $0x210] sm:$0xff] }
 0x211   :  { %4254 = vst [vmem:[#allocation2] sm:$0xff] %v4253_v18   ;;  %v1510_v37 = vmax.f32 %v1492_v23, 0.0 }
 0x213   :  { %v1518_v4 = vmax.f32 %v1506_v12, %v1510_v37  ;;  %v4186_v12 = vld [vmem:[%s5589_s3 + $0x180] sm:$0xff] }
 0x214   :  { %v4202_v37 = vld [vmem:[%s5589_s3 + $0x200] sm:$0xff] }
 0x215   :  { %v1522_v50 = vmax.f32 %v5181_v44, %v1518_v4 }
 0x216   :  { %v1493_v17 = vpop.f32.mrf.mxu0 }
 0x217   :  { %v1494_v29 = vadd.f32 %v1493_v17, %v1445_v30  ;;  %v4223_v30 = vld [vmem:[%s5589_s3 + $0x2a8] sm:$0xff]  ;;  %v4232_v17 = vld [vmem:[%s5589_s3 + $0x2f0] sm:$0xff] }
 0x218   :  { %v1532_v62 = vld [vmem:[#allocation2] sm:$0x1]  ;;  %v1549_v48 = vld [vmem:[#allocation2] sm:$0x2]  ;;  %v1694_v28 = vld [vmem:[#allocation2] sm:$0x4] }
 0x219   :  { %v1511_v20 = vmax.f32 %v1494_v29, 0.0  ;;  %1689 = vmatmul.bf16.vlgmr.msra.gmra.mxu2 %v1532_v62  ;;  %v1568_v9 = vunpack.c.l.b16 %v1549_v48  ;;  %v1713_v36 = vunpack.c.l.b16 %v1694_v28  ;;  %v1779_v8 = vld [vmem:[#allocation2] sm:$0x8]  ;;  %v1944_v13 = vld [vmem:[#allocation2 + $0x4] sm:$0x2]  ;;  %v4215_v62 = vld [vmem:[%s5589_s3 + $0x268] sm:$0xff] }
 0x21a   :  { %2185 = vmatpush.bf16.msra.mxu2 %v4201_v0  ;;  %v1798_v46 = vunpack.c.l.b16 %v1779_v8  ;;  %v1963_v53 = vunpack.c.l.b16 %v1944_v13  ;;  %v1864_v54 = vld [vmem:[#allocation2 + $0x4] sm:$0x1]  ;;  %v2114_v58 = vld [vmem:[#allocation2 + $0x4] sm:$0x8]  ;;  %v2029_v6 = vld [vmem:[#allocation2 + $0x4] sm:$0x4] }
 0x21b   :  { %v1519_v44 = vmax.f32 %v1507_v25, %v1511_v20  ;;  %v1569_v10 = vpack.c.b16 %v1568_v9, %v1568_v9  ;;  %v1714_v19 = vpack.c.b16 %v1713_v36, %v1713_v36  ;;  %v2133_v63 = vunpack.c.l.b16 %v2114_v58  ;;  %v4222_v29 = vld [vmem:[%s5589_s3 + $0x2a0] sm:$0xff]  ;;  %v4231_v48 = vld [vmem:[%s5589_s3 + $0x2e8] sm:$0xff]  ;;  %v4221_v28 = vld [vmem:[%s5589_s3 + $0x298] sm:$0xff] }
 0x21c   :  { %v1799_v47 = vpack.c.b16 %v1798_v46, %v1798_v46  ;;  %v1964_v56 = vpack.c.b16 %v1963_v53, %v1963_v53  ;;  %v2048_v18 = vunpack.c.l.b16 %v2029_v6  ;;  %v4214_v25 = vld [vmem:[%s5589_s3 + $0x260] sm:$0xff]  ;;  %v4220_v9 = vld [vmem:[%s5589_s3 + $0x290] sm:$0xff]  ;;  %v4213_v36 = vld [vmem:[%s5589_s3 + $0x258] sm:$0xff] }
 0x21d   :  { %v1523_v27 = vmax.f32 %v5212_v5, %v1519_v44  ;;  %v1570_v33 = vrot.slane %v1569_v10, 1  ;;  %v1715_v26 = vrot.slane %v1714_v19, 2  ;;  %v4208_v5 = vld [vmem:[%s5589_s3 + $0x230] sm:$0xff]  ;;  %v2134_v60 = vpack.c.b16 %v2133_v63, %v2133_v63  ;;  %v4230_v20 = vld [vmem:[%s5589_s3 + $0x2e0] sm:$0xff]  ;;  %v4219_v10 = vld [vmem:[%s5589_s3 + $0x288] sm:$0xff] }
 0x21e   :  { %2186 = vmatpush.bf16.msra.mxu2 %v4200_v16  ;;  %v1800_v34 = vrot.slane %v1799_v47, 3  ;;  %v1965_v22 = vrot.slane %v1964_v56, 1  ;;  %v2049_v4 = vpack.c.b16 %v2048_v18, %v2048_v18  ;;  %v4229_v16 = vld [vmem:[%s5589_s3 + $0x2d8] sm:$0xff]  ;;  %v4210_v13 = vld [vmem:[%s5589_s3 + $0x240] sm:$0xff]  ;;  %v4244_v56 = vld [vmem:[%s5589_s3 + $0x350] sm:$0xff] }
 0x21f   :  { %v4258_v7 = vpack.c.bf16 %v1523_v27, %v1522_v50  ;;  %1628 = vmatmul.bf16.vlgmr.msra.gmra.mxu1 %v1570_v33  ;;  %1773 = vmatmul.bf16.vlgmr.msra.gmra.mxu3 %v1715_v26  ;;  %v2135_v23 = vrot.slane %v2134_v60, 3  ;;  %v4216_v50 = vld [vmem:[%s5589_s3 + $0x270] sm:$0xff]  ;;  %v4218_v27 = vld [vmem:[%s5589_s3 + $0x280] sm:$0xff]  ;;  %v4245_v47 = vld [vmem:[%s5589_s3 + $0x358] sm:$0xff] }
 0x220   :  { %2100 = vmatpush.bf16.msra.mxu1 %v4193_v11  ;;  %2265 = vmatpush.bf16.msra.mxu3 %v4209_v21  ;;  %v2050_v51 = vrot.slane %v2049_v4, 2  ;;  %v4212_v11 = vld [vmem:[%s5589_s3 + $0x250] sm:$0xff]  ;;  %v4242_v58 = vld [vmem:[%s5589_s3 + $0x340] sm:$0xff]  ;;  %v2720_v4 = vld [vmem:[%s5591_s5 + $0x78] sm:$0xff] }
 0x221   :  { %4260 = vst [vmem:[#allocation2 + $0x8] sm:$0xff] %v4258_v7   ;;  %v4228_v21 = vld [vmem:[%s5589_s3 + $0x2d0] sm:$0xff]  ;;  %v4211_v7 = vld [vmem:[%s5589_s3 + $0x248] sm:$0xff] }
 0x222   :  { %2187 = vmatpush.bf16.msra.mxu2 %v4199_v35 }
 0x224   :  { %2101 = vmatpush.bf16.msra.mxu1 %v4192_v38  ;;  %2266 = vmatpush.bf16.msra.mxu3 %v4208_v5  ;;  %v4227_v38 = vld [vmem:[%s5589_s3 + $0x2c8] sm:$0xff] }
 0x226   :  { %2188 = vmatpush.bf16.msra.mxu2 %v4198_v39 }
 0x228   :  { %2102 = vmatpush.bf16.msra.mxu1 %v4191_v14  ;;  %2267 = vmatpush.bf16.msra.mxu3 %v4207_v41  ;;  %v2534_v3 = vld [vmem:[#allocation2 + $0xc] sm:$0x1]  ;;  %v2199_v0 = vld [vmem:[#allocation2 + $0x8] sm:$0x1]  ;;  %v2364_v44 = vld [vmem:[#allocation2 + $0x8] sm:$0x4] }
 0x229   :  { %1938 = vmatmul.bf16.vlgmr.msrb.gmra.mxu2 %v1864_v54  ;;  %2608 = vmatmul.bf16.vlgmr.msrb.gmra.mxu0 %v2534_v3  ;;  %v2383_v19 = vunpack.c.l.b16 %v2364_v44  ;;  %v2279_v33 = vld [vmem:[#allocation2 + $0x8] sm:$0x2]  ;;  %v2449_v26 = vld [vmem:[#allocation2 + $0x8] sm:$0x8]  ;;  %v4226_v14 = vld [vmem:[%s5589_s3 + $0x2c0] sm:$0xff] }
 0x22a   :  { %2189 = vmatpush.bf16.msra.mxu2 %v4197_v43  ;;  %v2298_v5 = vunpack.c.l.b16 %v2279_v33  ;;  %v2468_v39 = vunpack.c.l.b16 %v2449_v26  ;;  %v4249_v41 = vld [vmem:[%s5589_s3 + $0x378] sm:$0xff]  ;;  %v4248_v54 = vld [vmem:[%s5589_s3 + $0x370] sm:$0xff]  ;;  %v4247_v3 = vld [vmem:[%s5589_s3 + $0x368] sm:$0xff] }
 0x22b   :  { %v2384_v35 = vpack.c.b16 %v2383_v19, %v2383_v19  ;;  %v2708_v26 = vld [vmem:[%s5591_s5 + $0x18] sm:$0xff] }
 0x22c   :  { %2103 = vmatpush.bf16.msra.mxu1 %v4190_v52  ;;  %2268 = vmatpush.bf16.msra.mxu3 %v4206_v32  ;;  %v2299_v46 = vpack.c.b16 %v2298_v5, %v2298_v5  ;;  %v2469_v53 = vpack.c.b16 %v2468_v39, %v2468_v39  ;;  %v4246_v32 = vld [vmem:[%s5589_s3 + $0x360] sm:$0xff]  ;;  %v2707_v5 = vld [vmem:[%s5591_s5 + $0x10] sm:$0xff] }
 0x22d   :  { %v2385_v8 = vrot.slane %v2384_v35, 2 }
 0x22e   :  { %2190 = vmatpush.bf16.msra.mxu2 %v4196_v45  ;;  %v2300_v43 = vrot.slane %v2299_v46, 1  ;;  %v2470_v52 = vrot.slane %v2469_v53, 3  ;;  %v2614_v45 = vld [vmem:[#allocation2 + $0xc] sm:$0x2] }
 0x22f   :  { %1858 = vmatmul.bf16.vlgmr.msrb.gmra.mxu1 %v1800_v34  ;;  %2023 = vmatmul.bf16.vlgmr.msrb.gmra.mxu3 %v1965_v22 }
 0x230   :  { %2104 = vmatpush.bf16.msra.mxu1 %v4189_v59  ;;  %2269 = vmatpush.bf16.msra.mxu3 %v4205_v57  ;;  %v4243_v59 = vld [vmem:[%s5589_s3 + $0x348] sm:$0xff]  ;;  %v2633_v57 = vunpack.c.l.b16 %v2614_v45 }
 0x232   :  { %2191 = vmatpush.bf16.msra.mxu2 %v4195_v31  ;;  %v2634_v34 = vpack.c.b16 %v2633_v57, %v2633_v57  ;;  %v4264_v57 = vld [vmem:[%s5592_s6] ss:$0 sm:$0xff] }
 0x234   :  { %2105 = vmatpush.bf16.msra.mxu1 %v4188_v42  ;;  %2270 = vmatpush.bf16.msra.mxu3 %v4204_v1  ;;  %v2635_v22 = vrot.slane %v2634_v34, 1 }
 0x236   :  { %2192 = vmatpush.bf16.msra.mxu2 %v4194_v49 }
 0x238   :  { %2106 = vmatpush.bf16.msra.mxu1 %v4187_v61  ;;  %2271 = vmatpush.bf16.msra.mxu3 %v4203_v40 }
 0x239   :  { %2193 = vmatmul.bf16.vlgmr.msra.gmra.mxu2 %v2135_v23 }
 0x23a   :  { %2435 = vmatpush.bf16.msrb.mxu2 %v4225_v15 }
 0x23c   :  { %2107 = vmatpush.bf16.msra.mxu1 %v4186_v12  ;;  %2272 = vmatpush.bf16.msra.mxu3 %v4202_v37 }
 0x23e   :  { %2436 = vmatpush.bf16.msrb.mxu2 %v4224_v2 }
 0x23f   :  { %2108 = vmatmul.bf16.vlgmr.msra.gmra.mxu1 %v2050_v51  ;;  %2273 = vmatmul.bf16.vlgmr.msra.gmra.mxu3 %v2199_v0  ;;  %v2718_v51 = vld [vmem:[%s5591_s5 + $0x68] sm:$0xff] }
 0x240   :  { %2350 = vmatpush.bf16.msrb.mxu1 %v4217_v24  ;;  %2520 = vmatpush.bf16.msrb.mxu3 %v4233_v55 }
 0x242   :  { %2437 = vmatpush.bf16.msrb.mxu2 %v4223_v30  ;;  %v2719_v30 = vld [vmem:[%s5591_s5 + $0x70] sm:$0xff] }
 0x244   :  { %2351 = vmatpush.bf16.msrb.mxu1 %v4216_v50  ;;  %2521 = vmatpush.bf16.msrb.mxu3 %v4232_v17  ;;  %v2717_v50 = vld [vmem:[%s5591_s5 + $0x60] sm:$0xff] }
 0x246   :  { %2438 = vmatpush.bf16.msrb.mxu2 %v4222_v29 }
 0x248   :  { %2352 = vmatpush.bf16.msrb.mxu1 %v4215_v62  ;;  %2522 = vmatpush.bf16.msrb.mxu3 %v4231_v48  ;;  %v2716_v62 = vld [vmem:[%s5591_s5 + $0x58] sm:$0xff]  ;;  %v2715_v48 = vld [vmem:[%s5591_s5 + $0x50] sm:$0xff] }
 0x24a   :  { %2439 = vmatpush.bf16.msrb.mxu2 %v4221_v28 }
 0x24c   :  { %2353 = vmatpush.bf16.msrb.mxu1 %v4214_v25  ;;  %2523 = vmatpush.bf16.msrb.mxu3 %v4230_v20  ;;  %v2714_v25 = vld [vmem:[%s5591_s5 + $0x48] sm:$0xff] }
 0x24e   :  { %2440 = vmatpush.bf16.msrb.mxu2 %v4220_v9  ;;  %v2713_v9 = vld [vmem:[%s5591_s5 + $0x40] sm:$0xff] }
 0x250   :  { %2354 = vmatpush.bf16.msrb.mxu1 %v4213_v36  ;;  %2524 = vmatpush.bf16.msrb.mxu3 %v4229_v16  ;;  %v2712_v16 = vld [vmem:[%s5591_s5 + $0x38] sm:$0xff] }
 0x252   :  { %2441 = vmatpush.bf16.msrb.mxu2 %v4219_v10  ;;  %v2711_v10 = vld [vmem:[%s5591_s5 + $0x30] sm:$0xff] }
 0x254   :  { %2355 = vmatpush.bf16.msrb.mxu1 %v4212_v11  ;;  %2525 = vmatpush.bf16.msrb.mxu3 %v4228_v21  ;;  %v2710_v11 = vld [vmem:[%s5591_s5 + $0x28] sm:$0xff] }
 0x256   :  { %2442 = vmatpush.bf16.msrb.mxu2 %v4218_v27  ;;  %v2709_v27 = vld [vmem:[%s5591_s5 + $0x20] sm:$0xff] }
 0x258   :  { %2356 = vmatpush.bf16.msrb.mxu1 %v4211_v7  ;;  %2526 = vmatpush.bf16.msrb.mxu3 %v4227_v38 }
 0x259   :  { %2443 = vmatmul.bf16.vlgmr.msrb.gmra.mxu2 %v2385_v8  ;;  %v2706_v8 = vld [vmem:[%s5591_s5 + $0x8] sm:$0xff] }
 0x25a   :  { %2725 = vmatpush.msra.mxu2 %v2720_v4 }
 0x25c   :  { %2357 = vmatpush.bf16.msrb.mxu1 %v4210_v13  ;;  %2527 = vmatpush.bf16.msrb.mxu3 %v4226_v14  ;;  %v2705_v13 = vld [vmem:[%s5591_s5] sm:$0xff] }
 0x25d   :  { %2726 = vmatpush.msra.mxu2 %v2719_v30 }
 0x25f   :  { %2358 = vmatmul.bf16.vlgmr.msrb.gmra.mxu1 %v2300_v43  ;;  %2528 = vmatmul.bf16.vlgmr.msrb.gmra.mxu3 %v2470_v52 }
 0x260   :  { %2685 = vmatpush.bf16.msra.mxu1 %v4249_v41  ;;  %2727 = vmatpush.msra.mxu2 %v2718_v51 }
 0x262   :  { %2728 = vmatpush.msra.mxu2 %v2717_v50 }
 0x264   :  { %2686 = vmatpush.bf16.msra.mxu1 %v4248_v54  ;;  %2729 = vmatpush.msra.mxu2 %v2716_v62 }
 0x266   :  { %2730 = vmatpush.msra.mxu2 %v2715_v48 }
 0x268   :  { %2687 = vmatpush.bf16.msra.mxu1 %v4247_v3  ;;  %2731 = vmatpush.msra.mxu2 %v2714_v25  ;;  %v4263_v3 = vld [vmem:[%s5590_s4] ss:$0 sm:$0xff] }
 0x26a   :  { %2732 = vmatpush.msra.mxu2 %v2713_v9 }
 0x26c   :  { %2688 = vmatpush.bf16.msra.mxu1 %v4246_v32  ;;  %2733 = vmatpush.msra.mxu2 %v2712_v16 }
 0x26e   :  { %2734 = vmatpush.msra.mxu2 %v2711_v10 }
 0x270   :  { %2689 = vmatpush.bf16.msra.mxu1 %v4245_v47  ;;  %2735 = vmatpush.msra.mxu2 %v2710_v11 }
 0x272   :  { %2736 = vmatpush.msra.mxu2 %v2709_v27 }
 0x274   :  { %2690 = vmatpush.bf16.msra.mxu1 %v4244_v56  ;;  %2737 = vmatpush.msra.mxu2 %v2708_v26 }
 0x276   :  { %2738 = vmatpush.msra.mxu2 %v2707_v5 }
 0x278   :  { %2691 = vmatpush.bf16.msra.mxu1 %v4243_v59  ;;  %2739 = vmatpush.msra.mxu2 %v2706_v8 }
 0x27a   :  { %2740 = vmatpush.msra.mxu2 %v2705_v13 }
 0x27c   :  { %2692 = vmatpush.bf16.msra.mxu1 %v4242_v58 }
 0x27f   :  { %2693 = vmatmul.bf16.vlgmr.msra.gmra.mxu1 %v2635_v22 }
 0x29c   :  { %v1629_v31 = vpop.f32.mrf.mxu1  ;;  %v1690_v63 = vpop.f32.mrf.mxu2 }
 0x29d   :  { %v1691_v42 = vadd.f32 %v1690_v63, %v1629_v31 }
 0x2a2   :  { %v1774_v1 = vpop.f32.mrf.mxu3 }
 0x2a3   :  { %v1778_v28 = vadd.f32 %v1774_v1, %v1691_v42 }
 0x2a4   :  { %v1631_v49 = vpop.f32.mrf.mxu1  ;;  %v1692_v6 = vpop.f32.mrf.mxu2 }
 0x2a6   :  { %v2609_v15 = vpop.f32.mrf.mxu0 }
 0x2aa   :  { %v1776_v60 = vpop.f32.mrf.mxu3 }
 0x2ac   :  { %v1859_v61 = vpop.f32.mrf.mxu1  ;;  %v1939_v40 = vpop.f32.mrf.mxu2 }
 0x2ad   :  { %v1863_v20 = vadd.f32 %v1859_v61, %v1778_v28 }
 0x2ae   :  { %v2611_v18 = vpop.f32.mrf.mxu0 }
 0x2af   :  { %v1943_v44 = vadd.f32 %v1939_v40, %v1863_v20 }
 0x2b2   :  { %v2024_v23 = vpop.f32.mrf.mxu3 }
 0x2b3   :  { %v2028_v19 = vadd.f32 %v2024_v23, %v1943_v44 }
 0x2b4   :  { %v1861_v2 = vpop.f32.mrf.mxu1  ;;  %v1941_v12 = vpop.f32.mrf.mxu2 }
 0x2ba   :  { %v2026_v37 = vpop.f32.mrf.mxu3 }
 0x2bc   :  { %v2109_v24 = vpop.f32.mrf.mxu1  ;;  %v2194_v55 = vpop.f32.mrf.mxu2 }
 0x2bd   :  { %v2113_v21 = vadd.f32 %v2109_v24, %v2028_v19 }
 0x2bf   :  { %v2198_v33 = vadd.f32 %v2194_v55, %v2113_v21 }
 0x2c2   :  { %v2274_v17 = vpop.f32.mrf.mxu3 }
 0x2c3   :  { %v2278_v35 = vadd.f32 %v2274_v17, %v2198_v33 }
 0x2c4   :  { %v2111_v0 = vpop.f32.mrf.mxu1  ;;  %v2196_v29 = vpop.f32.mrf.mxu2 }
 0x2ca   :  { %v2276_v36 = vpop.f32.mrf.mxu3 }
 0x2dc   :  { %v2359_v7 = vpop.f32.mrf.mxu1  ;;  %v2444_v38 = vpop.f32.mrf.mxu2 }
 0x2dd   :  { %v2363_v39 = vadd.f32 %v2359_v7, %v2278_v35 }
 0x2df   :  { %v2448_v14 = vadd.f32 %v2444_v38, %v2363_v39 }
 0x2e2   :  { %v2529_v41 = vpop.f32.mrf.mxu3 }
 0x2e3   :  { %v2533_v46 = vadd.f32 %v2529_v41, %v2448_v14 }
 0x2e4   :  { %v2361_v53 = vpop.f32.mrf.mxu1  ;;  %v2446_v43 = vpop.f32.mrf.mxu2 }
 0x2e5   :  { %v2613_v52 = vadd.f32 %v2609_v15, %v2533_v46 }
 0x2ea   :  { %v2531_v54 = vpop.f32.mrf.mxu3 }
 0x2fc   :  { %v2694_v32 = vpop.f32.mrf.mxu1 }
 0x2fd   :  { %v2698_v47 = vadd.f32 %v2694_v32, %v2613_v52 }
 0x2ff   :  { %v2703_v56 = vadd.f32 %v4263_v3, %v2698_v47 }
 0x301   :  { %v2704_v45 = vmax.f32 %v2703_v56, 0.0 }
 0x303   :  { %2741 = vmatmul.f32.vlgmr.msra.gmra.mxu2 %v2704_v45 }
 0x304   :  { %v2696_v59 = vpop.f32.mrf.mxu1 }
 0x386   :  { %v2742_v58 = vpop.f32.mrf.mxu2 }
 0x387   :  { %v2743_v34 = vadd.f32 %v4264_v57, %v2742_v58 }
 0x389   :  { %2745 = vst [vmem:[#allocation3] sm:$0x3] %v2743_v34 }
 0x38a   :  { %2756 = dma.vmem_to_hbm [thread:$0]  %s2752_s10, 32, %s2754_s0, [#allocation4]  }
 0x38b   :  { %4289 = dma.done.wait [#allocation4], 32  }
 0x38c   :  { %4290 = vsyncadd [#allocation4], 4294967264 }
 0x38d   :  { %2761 = vsyncpa [#allocation4], 1 }

</bundles_post_ra>
